<compile_context>
chip_gen: v7x
topology: tpu7x:2x2x1
jax: 0.10.0
libtpu: 0.0.40
codegen_flags: <defaults>
</compile_context>

<pallas_src>
import functools

import jax
import jax.numpy as jnp
from jax import lax
from jax.experimental import pallas as pl
from jax.experimental.pallas import tpu as pltpu


# ----------------------------- Pallas kernel ------------------------------ #
def _conv3x3_kernel(x_ref, w_ref, b_ref, m_ref, o_ref, col_ref, *, C_in, W):
    """3x3 'SAME' conv over lane-flattened whole (H, W) images.

    x_ref:   (C_in, Lt)       Lt = s_chunk*H*W, lane-dense pixels
    w_ref:   (C_out, 9*C_in)  taps flattened onto the contraction axis
    b_ref:   (C_out, 1)       bias (f32)
    m_ref:   (8, Lt)          border masks for the 8 off-center taps
    o_ref:   (C_out, Lt)
    col_ref: (9*C_in, Lt)     im2col scratch (VMEM)
    """
    x = x_ref[...]
    mask_row = 0
    for kh in range(3):                       # static unroll over the 9 taps
        for kw in range(3):
            dh, dw = kh - 1, kw - 1
            d = dh * W + dw
            tap = kh * 3 + kw
            if d == 0:
                patch = x
            else:
                # shifted[:, l] == x[:, l + d]; lanes whose image-local
                # neighbour (h+dh, w+dw) falls outside the image are zeroed,
                # so the 'SAME' zero padding is never materialised and nothing
                # leaks across image or block boundaries.
                shifted = jnp.roll(x, -d, axis=1)
                patch = shifted * m_ref[mask_row:mask_row + 1, :]
                mask_row += 1
            col_ref[tap * C_in:(tap + 1) * C_in, :] = patch
    # Single fused MXU matmul over K = 9*C_in (instead of nine K=C_in dots).
    acc = jnp.dot(w_ref[...], col_ref[...],
                  preferred_element_type=jnp.float32)       # (C_out, Lt) f32
    o_ref[...] = (acc + b_ref[...]).astype(o_ref.dtype)


# ------------------------------ host helpers ------------------------------ #
def _border_masks(H, W, s_chunk, dtype):
    """(8, s_chunk*H*W) masks: 1 where the (dh, dw) neighbour is in-image."""
    pix = jnp.arange(H * W, dtype=jnp.int32)
    hh, ww = pix // W, pix % W
    rows = []
    for kh in range(3):
        for kw in range(3):
            dh, dw = kh - 1, kw - 1
            if dh == 0 and dw == 0:
                continue
            valid = ((hh + dh >= 0) & (hh + dh < H) &
                     (ww + dw >= 0) & (ww + dw < W))
            rows.append(valid)
    m = jnp.stack(rows, axis=0).astype(dtype)               # (8, H*W)
    return jnp.tile(m, (1, s_chunk))                        # (8, s_chunk*H*W)


def _choose_s_chunk(S, HW, C_in, C_out, itemsize,
                    budget_bytes=20 * 1024 * 1024):
    """Largest s-chunk (divisor of S, 128-aligned lane block) whose per-step
    VMEM footprint (double-buffered in/out/mask blocks + im2col scratch) fits
    the budget; biggest blocks amortise the ~0.35us/step pipeline overhead."""
    def vmem_bytes(s_chunk):
        Lt = s_chunk * HW
        dbl_buffered = 2 * (C_in + C_out + 8) * Lt * itemsize
        col_scratch = 9 * C_in * Lt * itemsize
        return dbl_buffered + col_scratch

    for d in range(S, 0, -1):
        if S % d:
            continue
        if d != S and (d * HW) % 128 != 0:
            continue
        if vmem_bytes(d) <= budget_bytes:
            return d
    # TODO(synk): sub-image lane tiling for very large H*W; fall back to the
    # smallest legal whole-image chunk even if it exceeds the soft budget.
    return 1 if HW % 128 == 0 else S


# --------------------------- conv via pallas_call -------------------------- #
def conv2d_3x3_seq(x3d, weight, bias, *, H, W, out_dtype):
    """x3d: (N, C_in, S*H*W) contiguous; weight: (C_out, C_in, 3, 3)."""
    N, C_in, L = x3d.shape
    C_out = weight.shape[0]
    HW = H * W
    S = L // HW
    assert S * HW == L, (S, HW, L)

    cdt = x3d.dtype
    s_chunk = _choose_s_chunk(S, HW, C_in, C_out, jnp.dtype(cdt).itemsize)
    Lt = s_chunk * HW
    num_chunks = S // s_chunk

    # Flatten taps so im2col row (tap*C_in + ci) pairs with w_flat[:, same].
    w_flat = jnp.transpose(weight, (0, 2, 3, 1)).reshape(C_out, 9 * C_in)
    w_flat = w_flat.astype(cdt)
    b2d = bias.reshape(C_out, 1).astype(jnp.float32)
    masks = _border_masks(H, W, s_chunk, cdt)               # (8, Lt)

    kernel = functools.partial(_conv3x3_kernel, C_in=C_in, W=W)

    return pl.pallas_call(
        kernel,
        out_shape=jax.ShapeDtypeStruct((N, C_out, L), out_dtype),
        grid_spec=pltpu.PrefetchScalarGridSpec(
            num_scalar_prefetch=0,
            grid=(N, num_chunks),
            in_specs=[
                pl.BlockSpec((None, C_in, Lt), lambda i, j: (i, 0, j)),
                pl.BlockSpec((C_out, 9 * C_in), lambda i, j: (0, 0)),
                pl.BlockSpec((C_out, 1), lambda i, j: (0, 0)),
                pl.BlockSpec((8, Lt), lambda i, j: (0, 0)),
            ],
            out_specs=pl.BlockSpec((None, C_out, Lt), lambda i, j: (i, 0, j)),
            scratch_shapes=[pltpu.VMEM((9 * C_in, Lt), cdt)],
        ),
        compiler_params=pltpu.CompilerParams(
            dimension_semantics=("parallel", "parallel"),
            vmem_limit_bytes=32 * 1024 * 1024,
        ),
    )(x3d, w_flat, b2d, masks)


# ------------------------- SetBlockWrapperseqL ----------------------------- #
def set_block_wrapper_seql(info, weight, bias):
    """Mirrors SetBlockWrapperseqL.forward with forward_block = Conv2d(3x3)+bias.

    seqL / dim are threaded through untouched (the torch wrapper's fold/unfold
    path does not use them for a convolutional forward_block).
    """
    x, seqL, dim = info
    n, c, s, h, w = x.shape
    c_out = weight.shape[0]
    # Free contiguous reshapes on both ends -- no HBM transpose passes.
    x3d = x.reshape(n, c, s * h * w)
    y3d = conv2d_3x3_seq(x3d, weight, bias, H=h, W=w, out_dtype=x.dtype)
    return y3d.reshape(n, c_out, s, h, w)


# --------------------------------- main ------------------------------------ #
if __name__ == "__main__":
    key = jax.random.PRNGKey(0)
    k_x, k_w, k_b = jax.random.split(key, 3)

    n, c, s, h, w = 2, 4, 8, 16, 16
    c_out = 8

    x = jax.random.normal(k_x, (n, c, s, h, w), dtype=jnp.float32)
    weight = (jax.random.normal(k_w, (c_out, c, 3, 3), dtype=jnp.float32)
              * (1.0 / (c * 9) ** 0.5))
    bias = jax.random.normal(k_b, (c_out,), dtype=jnp.float32) * 0.1
    seqL = None
    dim = 2

    out = set_block_wrapper_seql((x, seqL, dim), weight, bias)
    out = jax.block_until_ready(out)

    # pure-JAX reference: fold, conv 'SAME', unfold (mirrors the torch module)
    x_folded = jnp.transpose(x, (0, 2, 1, 3, 4)).reshape(n * s, c, h, w)
    y_ref = lax.conv_general_dilated(
        x_folded, weight, window_strides=(1, 1), padding="SAME",
        dimension_numbers=("NCHW", "OIHW", "NCHW"),
        precision=lax.Precision.HIGHEST,
    ) + bias.reshape(1, c_out, 1, 1)
    ref = jnp.transpose(y_ref.reshape(n, s, c_out, h, w), (0, 2, 1, 3, 4))

    assert out.shape == (n, c_out, s, h, w), out.shape
    err = float(jnp.max(jnp.abs(out - ref)))
    assert err < 1e-2, err

    print("KERNEL_OK")
</pallas_src>

<mosaic_0001>
module attributes {stable_mosaic.version = 11 : i64} {
  func.func @_conv3x3_kernel(%arg0: i32, %arg1: i32, %arg2: memref<1x4x2048xf32, #tpu.memory_space<vmem>>, %arg3: memref<8x36xf32, #tpu.memory_space<vmem>>, %arg4: memref<8x1xf32, #tpu.memory_space<vmem>>, %arg5: memref<8x2048xf32, #tpu.memory_space<vmem>>, %arg6: memref<1x8x2048xf32, #tpu.memory_space<vmem>>, %arg7: memref<36x2048xf32, #tpu.memory_space<vmem>>) attributes {dimension_semantics = [#tpu.dimension_semantics<parallel>, #tpu.dimension_semantics<parallel>], iteration_bounds = array<i64: 2, 1>, scalar_prefetch = 0 : i64, scratch_operands = 1 : i64, tpu.core_type = #tpu.core_type<tc>, window_params = [{transform_indices = @transform_0, window_bounds = array<i64: 1, 4, 2048>}, {pipeline_mode = #tpu.pipeline_mode<synchronous>, transform_indices = @transform_1, window_bounds = array<i64: 8, 36>}, {pipeline_mode = #tpu.pipeline_mode<synchronous>, transform_indices = @transform_2, window_bounds = array<i64: 8, 1>}, {pipeline_mode = #tpu.pipeline_mode<synchronous>, transform_indices = @transform_3, window_bounds = array<i64: 8, 2048>}, {transform_indices = @transform_4, window_bounds = array<i64: 1, 8, 2048>}]} {
    %c0 = arith.constant 0 : index
    %c0_0 = arith.constant 0 : index
    %c0_1 = arith.constant 0 : index
    %0 = vector.load %arg2[%c0, %c0_0, %c0_1] : memref<1x4x2048xf32, #tpu.memory_space<vmem>>, vector<1x4x2048xf32>
    %1 = vector.shape_cast %0 : vector<1x4x2048xf32> to vector<4x2048xf32>
    %2 = vector.extract_strided_slice %1 {offsets = [0, 2031], sizes = [4, 17], strides = [1, 1]} : vector<4x2048xf32> to vector<4x17xf32>
    %3 = vector.extract_strided_slice %1 {offsets = [0, 0], sizes = [4, 2031], strides = [1, 1]} : vector<4x2048xf32> to vector<4x2031xf32>
    %4 = tpu.concatenate %2, %3 in 1 : vector<4x17xf32>, vector<4x2031xf32> -> vector<4x2048xf32>
    %c0_2 = arith.constant 0 : index
    %c0_3 = arith.constant 0 : index
    %5 = vector.load %arg5[%c0_2, %c0_3] : memref<8x2048xf32, #tpu.memory_space<vmem>>, vector<1x2048xf32>
    %6 = vector.broadcast %5 : vector<1x2048xf32> to vector<4x2048xf32>
    %7 = arith.mulf %4, %6 : vector<4x2048xf32>
    %c0_4 = arith.constant 0 : index
    %c0_5 = arith.constant 0 : index
    %8 = vector.load %arg7[%c0_4, %c0_5] : memref<36x2048xf32, #tpu.memory_space<vmem>>, vector<4x2048xf32>
    tpu.vector_store %arg7[%c0_4, %c0_5], %7 {strides = array<i32>} : memref<36x2048xf32, #tpu.memory_space<vmem>>, vector<4x2048xf32>,
    %9 = vector.extract_strided_slice %1 {offsets = [0, 2032], sizes = [4, 16], strides = [1, 1]} : vector<4x2048xf32> to vector<4x16xf32>
    %10 = vector.extract_strided_slice %1 {offsets = [0, 0], sizes = [4, 2032], strides = [1, 1]} : vector<4x2048xf32> to vector<4x2032xf32>
    %11 = tpu.concatenate %9, %10 in 1 : vector<4x16xf32>, vector<4x2032xf32> -> vector<4x2048xf32>
    %c1 = arith.constant 1 : index
    %c0_6 = arith.constant 0 : index
    %12 = vector.load %arg5[%c1, %c0_6] : memref<8x2048xf32, #tpu.memory_space<vmem>>, vector<1x2048xf32>
    %13 = vector.broadcast %12 : vector<1x2048xf32> to vector<4x2048xf32>
    %14 = arith.mulf %11, %13 : vector<4x2048xf32>
    %c4 = arith.constant 4 : index
    %c0_7 = arith.constant 0 : index
    %15 = vector.load %arg7[%c4, %c0_7] : memref<36x2048xf32, #tpu.memory_space<vmem>>, vector<4x2048xf32>
    tpu.vector_store %arg7[%c4, %c0_7], %14 {strides = array<i32>} : memref<36x2048xf32, #tpu.memory_space<vmem>>, vector<4x2048xf32>,
    %16 = vector.extract_strided_slice %1 {offsets = [0, 2033], sizes = [4, 15], strides = [1, 1]} : vector<4x2048xf32> to vector<4x15xf32>
    %17 = vector.extract_strided_slice %1 {offsets = [0, 0], sizes = [4, 2033], strides = [1, 1]} : vector<4x2048xf32> to vector<4x2033xf32>
    %18 = tpu.concatenate %16, %17 in 1 : vector<4x15xf32>, vector<4x2033xf32> -> vector<4x2048xf32>
    %c2 = arith.constant 2 : index
    %c0_8 = arith.constant 0 : index
    %19 = vector.load %arg5[%c2, %c0_8] : memref<8x2048xf32, #tpu.memory_space<vmem>>, vector<1x2048xf32>
    %20 = vector.broadcast %19 : vector<1x2048xf32> to vector<4x2048xf32>
    %21 = arith.mulf %18, %20 : vector<4x2048xf32>
    %c8 = arith.constant 8 : index
    %c0_9 = arith.constant 0 : index
    %22 = vector.load %arg7[%c8, %c0_9] : memref<36x2048xf32, #tpu.memory_space<vmem>>, vector<4x2048xf32>
    tpu.vector_store %arg7[%c8, %c0_9], %21 {strides = array<i32>} : memref<36x2048xf32, #tpu.memory_space<vmem>>, vector<4x2048xf32>,
    %23 = vector.extract_strided_slice %1 {offsets = [0, 2047], sizes = [4, 1], strides = [1, 1]} : vector<4x2048xf32> to vector<4x1xf32>
    %24 = vector.extract_strided_slice %1 {offsets = [0, 0], sizes = [4, 2047], strides = [1, 1]} : vector<4x2048xf32> to vector<4x2047xf32>
    %25 = tpu.concatenate %23, %24 in 1 : vector<4x1xf32>, vector<4x2047xf32> -> vector<4x2048xf32>
    %c3 = arith.constant 3 : index
    %c0_10 = arith.constant 0 : index
    %26 = vector.load %arg5[%c3, %c0_10] : memref<8x2048xf32, #tpu.memory_space<vmem>>, vector<1x2048xf32>
    %27 = vector.broadcast %26 : vector<1x2048xf32> to vector<4x2048xf32>
    %28 = arith.mulf %25, %27 : vector<4x2048xf32>
    %c12 = arith.constant 12 : index
    %c0_11 = arith.constant 0 : index
    %29 = vector.load %arg7[%c12, %c0_11] : memref<36x2048xf32, #tpu.memory_space<vmem>>, vector<4x2048xf32>
    tpu.vector_store %arg7[%c12, %c0_11], %28 {strides = array<i32>} : memref<36x2048xf32, #tpu.memory_space<vmem>>, vector<4x2048xf32>,
    %c16 = arith.constant 16 : index
    %c0_12 = arith.constant 0 : index
    %30 = vector.load %arg7[%c16, %c0_12] : memref<36x2048xf32, #tpu.memory_space<vmem>>, vector<4x2048xf32>
    tpu.vector_store %arg7[%c16, %c0_12], %1 {strides = array<i32>} : memref<36x2048xf32, #tpu.memory_space<vmem>>, vector<4x2048xf32>,
    %31 = vector.extract_strided_slice %1 {offsets = [0, 1], sizes = [4, 2047], strides = [1, 1]} : vector<4x2048xf32> to vector<4x2047xf32>
    %32 = vector.extract_strided_slice %1 {offsets = [0, 0], sizes = [4, 1], strides = [1, 1]} : vector<4x2048xf32> to vector<4x1xf32>
    %33 = tpu.concatenate %31, %32 in 1 : vector<4x2047xf32>, vector<4x1xf32> -> vector<4x2048xf32>
    %c4_13 = arith.constant 4 : index
    %c0_14 = arith.constant 0 : index
    %34 = vector.load %arg5[%c4_13, %c0_14] : memref<8x2048xf32, #tpu.memory_space<vmem>>, vector<1x2048xf32>
    %35 = vector.broadcast %34 : vector<1x2048xf32> to vector<4x2048xf32>
    %36 = arith.mulf %33, %35 : vector<4x2048xf32>
    %c20 = arith.constant 20 : index
    %c0_15 = arith.constant 0 : index
    %37 = vector.load %arg7[%c20, %c0_15] : memref<36x2048xf32, #tpu.memory_space<vmem>>, vector<4x2048xf32>
    tpu.vector_store %arg7[%c20, %c0_15], %36 {strides = array<i32>} : memref<36x2048xf32, #tpu.memory_space<vmem>>, vector<4x2048xf32>,
    %38 = vector.extract_strided_slice %1 {offsets = [0, 15], sizes = [4, 2033], strides = [1, 1]} : vector<4x2048xf32> to vector<4x2033xf32>
    %39 = vector.extract_strided_slice %1 {offsets = [0, 0], sizes = [4, 15], strides = [1, 1]} : vector<4x2048xf32> to vector<4x15xf32>
    %40 = tpu.concatenate %38, %39 in 1 : vector<4x2033xf32>, vector<4x15xf32> -> vector<4x2048xf32>
    %c5 = arith.constant 5 : index
    %c0_16 = arith.constant 0 : index
    %41 = vector.load %arg5[%c5, %c0_16] : memref<8x2048xf32, #tpu.memory_space<vmem>>, vector<1x2048xf32>
    %42 = vector.broadcast %41 : vector<1x2048xf32> to vector<4x2048xf32>
    %43 = arith.mulf %40, %42 : vector<4x2048xf32>
    %c24 = arith.constant 24 : index
    %c0_17 = arith.constant 0 : index
    %44 = vector.load %arg7[%c24, %c0_17] : memref<36x2048xf32, #tpu.memory_space<vmem>>, vector<4x2048xf32>
    tpu.vector_store %arg7[%c24, %c0_17], %43 {strides = array<i32>} : memref<36x2048xf32, #tpu.memory_space<vmem>>, vector<4x2048xf32>,
    %45 = vector.extract_strided_slice %1 {offsets = [0, 16], sizes = [4, 2032], strides = [1, 1]} : vector<4x2048xf32> to vector<4x2032xf32>
    %46 = vector.extract_strided_slice %1 {offsets = [0, 0], sizes = [4, 16], strides = [1, 1]} : vector<4x2048xf32> to vector<4x16xf32>
    %47 = tpu.concatenate %45, %46 in 1 : vector<4x2032xf32>, vector<4x16xf32> -> vector<4x2048xf32>
    %c6 = arith.constant 6 : index
    %c0_18 = arith.constant 0 : index
    %48 = vector.load %arg5[%c6, %c0_18] : memref<8x2048xf32, #tpu.memory_space<vmem>>, vector<1x2048xf32>
    %49 = vector.broadcast %48 : vector<1x2048xf32> to vector<4x2048xf32>
    %50 = arith.mulf %47, %49 : vector<4x2048xf32>
    %c28 = arith.constant 28 : index
    %c0_19 = arith.constant 0 : index
    %51 = vector.load %arg7[%c28, %c0_19] : memref<36x2048xf32, #tpu.memory_space<vmem>>, vector<4x2048xf32>
    tpu.vector_store %arg7[%c28, %c0_19], %50 {strides = array<i32>} : memref<36x2048xf32, #tpu.memory_space<vmem>>, vector<4x2048xf32>,
    %52 = vector.extract_strided_slice %1 {offsets = [0, 17], sizes = [4, 2031], strides = [1, 1]} : vector<4x2048xf32> to vector<4x2031xf32>
    %53 = vector.extract_strided_slice %1 {offsets = [0, 0], sizes = [4, 17], strides = [1, 1]} : vector<4x2048xf32> to vector<4x17xf32>
    %54 = tpu.concatenate %52, %53 in 1 : vector<4x2031xf32>, vector<4x17xf32> -> vector<4x2048xf32>
    %c7 = arith.constant 7 : index
    %c0_20 = arith.constant 0 : index
    %55 = vector.load %arg5[%c7, %c0_20] : memref<8x2048xf32, #tpu.memory_space<vmem>>, vector<1x2048xf32>
    %56 = vector.broadcast %55 : vector<1x2048xf32> to vector<4x2048xf32>
    %57 = arith.mulf %54, %56 : vector<4x2048xf32>
    %c32 = arith.constant 32 : index
    %c0_21 = arith.constant 0 : index
    %58 = vector.load %arg7[%c32, %c0_21] : memref<36x2048xf32, #tpu.memory_space<vmem>>, vector<4x2048xf32>
    tpu.vector_store %arg7[%c32, %c0_21], %57 {strides = array<i32>} : memref<36x2048xf32, #tpu.memory_space<vmem>>, vector<4x2048xf32>,
    %c0_22 = arith.constant 0 : index
    %c0_23 = arith.constant 0 : index
    %59 = vector.load %arg3[%c0_22, %c0_23] : memref<8x36xf32, #tpu.memory_space<vmem>>, vector<8x36xf32>
    %c0_24 = arith.constant 0 : index
    %c0_25 = arith.constant 0 : index
    %60 = vector.load %arg7[%c0_24, %c0_25] : memref<36x2048xf32, #tpu.memory_space<vmem>>, vector<36x2048xf32>
    %cst = arith.constant dense<0.000000e+00> : vector<8x2048xf32>
    %61 = tpu.matmul %59, %60, %cst {dimension_numbers = #tpu.dot_dimension_numbers<[1], [0], [0], [1], [0, 0, 1, 1], [], []>} : vector<8x36xf32>, vector<36x2048xf32>, vector<8x2048xf32> -> vector<8x2048xf32>
    %c0_26 = arith.constant 0 : index
    %c0_27 = arith.constant 0 : index
    %62 = vector.load %arg4[%c0_26, %c0_27] : memref<8x1xf32, #tpu.memory_space<vmem>>, vector<8x1xf32>
    %63 = vector.broadcast %62 : vector<8x1xf32> to vector<8x2048xf32>
    %64 = arith.addf %61, %63 : vector<8x2048xf32>
    %c0_28 = arith.constant 0 : index
    %c0_29 = arith.constant 0 : index
    %c0_30 = arith.constant 0 : index
    %65 = vector.load %arg6[%c0_28, %c0_29, %c0_30] : memref<1x8x2048xf32, #tpu.memory_space<vmem>>, vector<1x8x2048xf32>
    %66 = vector.shape_cast %65 : vector<1x8x2048xf32> to vector<8x2048xf32>
    %67 = vector.shape_cast %64 : vector<8x2048xf32> to vector<1x8x2048xf32>
    tpu.vector_store %arg6[%c0_28, %c0_29, %c0_30], %67 {strides = array<i32>} : memref<1x8x2048xf32, #tpu.memory_space<vmem>>, vector<1x8x2048xf32>,
    return
  }
  func.func @transform_0(%arg0: i32, %arg1: i32) -> (i32, i32, i32) {
    %c0_i32 = arith.constant 0 : i32
    %c0_i32_0 = arith.constant 0 : i32
    return %arg0, %c0_i32, %arg1 : i32, i32, i32
  }
  func.func @transform_1(%arg0: i32, %arg1: i32) -> (i32, i32) {
    %c0_i32 = arith.constant 0 : i32
    %c0_i32_0 = arith.constant 0 : i32
    %c0_i32_1 = arith.constant 0 : i32
    return %c0_i32, %c0_i32_0 : i32, i32
  }
  func.func @transform_2(%arg0: i32, %arg1: i32) -> (i32, i32) {
    %c0_i32 = arith.constant 0 : i32
    %c0_i32_0 = arith.constant 0 : i32
    %c0_i32_1 = arith.constant 0 : i32
    return %c0_i32, %c0_i32_0 : i32, i32
  }
  func.func @transform_3(%arg0: i32, %arg1: i32) -> (i32, i32) {
    %c0_i32 = arith.constant 0 : i32
    %c0_i32_0 = arith.constant 0 : i32
    %c0_i32_1 = arith.constant 0 : i32
    return %c0_i32, %c0_i32_0 : i32, i32
  }
  func.func @transform_4(%arg0: i32, %arg1: i32) -> (i32, i32, i32) {
    %c0_i32 = arith.constant 0 : i32
    %c0_i32_0 = arith.constant 0 : i32
    return %arg0, %c0_i32, %arg1 : i32, i32, i32
  }
}

</mosaic_0001>

<bundles_post_ra>
// kernel: tpu_custom_call.1
= control target key start
LH: loop header
LB: loop body
LE: loop exit
PB: predicated region body
PF: predicated region fallthrough
CT: control target
= control target key end

     0   :  { %9 = vsyncpa [#allocation4], 0  ;;  %s4402_s0 = inlined_call_operand.hbm [shape: f32[2,4,2048], index: 0, kind: input, shape index: {}]   ;;  %s4403_s1 = inlined_call_operand.vmem [shape: f32[8,36], index: 1, kind: input, shape index: {}]   ;;  %s4404_s2 = inlined_call_operand.vmem [shape: f32[8,1], index: 2, kind: input, shape index: {}]   ;;  %s4405_s3 = inlined_call_operand.hbm [shape: f32[8,2048], index: 3, kind: input, shape index: {}]   ;;  %s4406_s4 = inlined_call_operand.hbm [shape: f32[2,8,2048], index: 4, kind: output, shape index: {}]  }
   0x1   :  { %11 = vsyncpa [#allocation4 + $0x1], 0 }
   0x2   :  { %12 = vsyncpa [#allocation7], 0 }
   0x3   :  { %13 = vsyncpa [#allocation5], 0 }
   0x4   :  { %15 = vsyncpa [#allocation5 + $0x1], 0  ;;  %s3209_s15 = smov 0   ;;  %s3211_s16 = smov 0  }
   0x5   :  { %s3213_s17 = smov 0   ;;  %s3215_s18 = smov 0  }
   0x6   :  { %s3217_s19 = smov 0   ;;  %s3219_s20 = smov 0  }
   0x7 LB: > { %s2825_s21 = sadd.s32 4294967295, %s3169_s20   ;;  %s2826_s22 = sadd.s32 4294967294, %s3169_s20   ;;  %s3169_s20 = sphi %s3219_s20, %s21_s20   ;;  %s3165_s19 = sphi %s3217_s19, %s4431_s19   ;;  %s3161_s18 = sphi %s3215_s18, %s4430_s18   ;;  %s3157_s17 = sphi %s3213_s17, %s4429_s17   ;;  %s3153_s16 = sphi %s3211_s16, %s4428_s16   ;;  %s3149_s15 = sphi %s3209_s15, %s4427_s15  }
   0x8   : > { %p55_p0 = scmp.ne.s32.totalorder %s3153_s16, %s3149_s15  ;;  %p3243_p1 = scmp.eq.s32.totalorder %s2825_s21, 0 }
   0x9   : > { %p3247_p2 = scmp.eq.s32.totalorder %s2825_s21, 1  ;;  %p150_p3 = scmp.eq.s32.totalorder %s2826_s22, 1 }
   0xa   : > { %s4411_s23 = scalar_select %p3243_p1, 1, 0 }
   0xb   : > { %s4412_s24 = scalar_select %p3247_p2, 1, 0 }
   0xc   : > { %p3253_p4 = por %p3243_p1, %p55_p0  ;;  %p2827_p5 = scmp.ge.s32.totalorder %s3169_s20, 1 }
   0xd   : > { %p3258_p6 = por %p150_p3, %p55_p0  ;;  %p157_p7 = scmp.lt.s32.totalorder %s3169_s20, 3 }
   0xe   : > { %s4413_s25 = scalar_select %p3253_p4, 1, 0 }
   0xf   : > { %s4414_s26 = scalar_select %p3258_p6, 1, 0 }
  0x10   : > { %p3263_p8 = pnand %p2827_p5, %p157_p7  ;;  %s3171_s28 = smov [#allocation6]  }
  0x11   : > { %s176_s29 = sshll.u32 %s3171_s28, 4  ;;  %s33_s5 = sadd.s32 1, %s3165_s19  ;;  %s177_s29 = int_to_ptr.vmem [resolvable:$true] %s176_s29 }
  0x12   : > { %s4415_s27 = scalar_select %p3263_p8, 1, 0 }
  0x13   : > { %p2940_p10 = pneg %p3263_p8  ;;  %s42_s6 = sadd.s32 1, %s3157_s17 }
  0x14   : > { %p3278_p12 = scmp.ge.s32.totalorder %s33_s5, 2  ;;  %s3025_s10 = scalar_lea.hbm %s4405_s3, 2048 }
  0x15   : > { %p3272_p11 = pnand %p2940_p10, %p3243_p1  ;;  %p3026_p13 = scmp.ne.s32.totalorder %s4405_s3, %s3025_s10 }
  0x16   : > { %s4417_s7 = scalar_select %p3278_p12, 1, 0 }
  0x17   : > { %p3027_p0 = pneg %p3272_p11  ;;  %p3032_p7 = scmp.lt.u32.totalorder %s3025_s10, %s4405_s3 }
  0x19   : > { %p3028_p3 = pnand %p3027_p0, %p3026_p13 }
  0x1b   : > { %p3029_p5 = pneg %p3028_p3 }
  0x1d   : > { %p3034_p10 = pnand %p3032_p7, %p3029_p5 }
  0x1f   : > { %3037 = shalt.err (!%p3034_p10)
}
  0x20   : > { %s3038_s21 = scalar_lea.vmem %s177_s29, 2048  ;;  %p3046_p4 = scmp.lt.s32.totalorder %s177_s29, %s177_s29 }
  0x21   : > { %p3039_p9 = scmp.ne.s32.totalorder %s177_s29, %s3038_s21  ;;  %p3047_p8 = scmp.lt.s32.totalorder %s3038_s21, %s3038_s21 }
  0x23   : > { %p3041_p6 = pnand %p3039_p9, %p3027_p0  ;;  %p3048_p2 = por %p3047_p8, %p3046_p4 }
  0x25   : > { %p3042_p1 = pneg %p3041_p6 }
  0x27   : > { %p3049_p12 = pnand %p3048_p2, %p3042_p1 }
  0x29   : > { %3052 = shalt.err (!%p3049_p12)
}
  0x2a   : > { %2943 = dma.hbm_to_vmem [thread:$0]  (!%p3272_p11), %s4405_s3, 2048, %s177_s29, [#allocation7]  }
  0x2b   : > { %p4418_p4 = scmp.ne.s32.totalorder %s4417_s7, 0  ;;  %p49_p1 = scmp.ne.s32.totalorder %s3157_s17, %s3153_s16 }
  0x2c   : > { %p50_p2 = scmp.eq.s32.totalorder %s3169_s20, 0  ;;  %p2953_p6 = scmp.lt.s32.totalorder %s3169_s20, 2 }
  0x2d   : > { %s4433_s5 = smov (%p4418_p4, %s33_s5), 0  ;;  %p4419_p12 = scmp.ne.s32.totalorder %s4412_s24, 0 }
  0x2e   : > { %s37_s30 = ssub.s32 %s3165_s19, %s4433_s5  ;;  %p51_p9 = por %p50_p2, %p49_p1 }
  0x2f   : > { %p40_p8 = scmp.eq.s32.totalorder %s37_s30, 0  ;;  %p3310_p13 = por %p4419_p12, %p49_p1 }
  0x30   : > { %s187_s9 = sand.u32 1, %s3157_s17   ;;  %s2866_s7 = sshll.u32 %s3165_s19, 10 }
  0x31   : > { %s3318_s10 = scalar_select %p40_p8, %s3157_s17, %s42_s6  }
  0x32   : > { %s2830_s29 = sshll.u32 %s187_s9, 6  ;;  %s3324_s13 = scalar_lea.hbm %s4402_s0, %s2866_s7 }
  0x33   : > { %s191_s24 = scalar_lea.vmem [#allocation3], %s2830_s29  ;;  %p3328_p11 = pnand %p2953_p6, %p51_p9 }
  0x34   : > { %s201_s14 = sshll.u32 %s191_s24, 4  ;;  %s188_s6 = scalar_lea.sflag [#allocation4], %s187_s9  ;;  %s3326_s14 = int_to_ptr.vmem [resolvable:$true] %s201_s14 }
  0x35   : > { %s3053_s22 = scalar_lea.hbm %s3324_s13, 1024  ;;  %p3055_p3 = pneg %p3328_p11 }
  0x36   : > { %p3054_p0 = scmp.ne.s32.totalorder %s3324_s13, %s3053_s22  ;;  %s3058_s29 = scalar_lea.hbm %s4402_s0, 2048 }
  0x37   : > { %p3059_p10 = scmp.lt.u32.totalorder %s3324_s13, %s4402_s0  ;;  %p3060_p4 = scmp.lt.u32.totalorder %s3058_s29, %s3053_s22 }
  0x38   : > { %p3056_p5 = pnand %p3055_p3, %p3054_p0  ;;  %p3062_p2 = scmp.lt.u32.totalorder %s3053_s22, %s3324_s13 }
  0x39   : > { %p3061_p1 = por %p3060_p4, %p3059_p10 }
  0x3a   : > { %p3057_p7 = pneg %p3056_p5 }
  0x3b   : > { %p3063_p6 = por %p3062_p2, %p3061_p1 }
  0x3d   : > { %p3064_p8 = pnand %p3063_p6, %p3057_p7 }
  0x3f   : > { %3067 = shalt.err (!%p3064_p8)
}
  0x40   : > { %s3068_s9 = scalar_lea.vmem %s3326_s14, 1024  ;;  %s3172_s12 = smov [#allocation3]  }
  0x41   : > { %p3069_p9 = scmp.ne.s32.totalorder %s3326_s14, %s3068_s9  ;;  %s3073_s24 = sshll.u32 %s3172_s12, 4  ;;  %s3074_s24 = int_to_ptr.vmem [resolvable:$false] %s3073_s24 }
  0x42   : > { %s3075_s28 = scalar_lea.vmem %s3074_s24, 2048  ;;  %p3076_p5 = scmp.lt.s32.totalorder %s3326_s14, %s3074_s24 }
  0x43   : > { %p3071_p12 = pnand %p3069_p9, %p3055_p3  ;;  %p3077_p10 = scmp.lt.s32.totalorder %s3075_s28, %s3068_s9 }
  0x45   : > { %p3072_p0 = pneg %p3071_p12  ;;  %p3078_p4 = por %p3077_p10, %p3076_p5 }
  0x47   : > { %p3079_p1 = pnand %p3078_p4, %p3072_p0 }
  0x49   : > { %3082 = shalt.err (!%p3079_p1)
}
  0x4a   : > { %2947 = dma.hbm_to_vmem [thread:$0]  (!%p3328_p11), %s3324_s13, 1024, %s3326_s14, %s188_s6  }
  0x4b   : > { %p4422_p7 = scmp.ne.s32.totalorder %s4415_s27, 0 }
  0x4c   : > { %s3360_s22 = sand.u32 (!%p4422_p7), 1, %s3153_s16   ;;  %p4423_p3 = scmp.ne.s32.totalorder (!%p4422_p7), %s4413_s25, 0 }
  0x4d   : > { %210 = sbr.rel (%p4422_p7) target bundleno = 701 (0x2bd), region = 36  ;;  %s2834_s30 = sshll.u32 (!%p4422_p7), %s3360_s22, 6 }
  0x4e   : > { %s213_s29 = scalar_lea.sflag (!%p4422_p7), [#allocation4], %s3360_s22  ;;  %s3364_s7 = scalar_lea.vmem (!%p4422_p7), [#allocation3], %s2834_s30 }
  0x54   : > { %3136 = dma.done.wait (%p4423_p3), %s213_s29, 1024  }
  0x55   : > { %3138 = vsyncadd (%p4423_p3), %s213_s29, 4294966272  ;;  %p4424_p11 = scmp.ne.s32.totalorder %s4411_s23, 0 }
  0x57   : > { %3140 = dma.done.wait (%p4424_p11), [#allocation7], 2048  }
  0x58   : > { %3142 = vsyncadd (%p4424_p11), [#allocation7], 4294965248  ;;  %v3375_v0 = vld [vmem:[%s3364_s7 + $0x8] sm:$0xff]  ;;  %v3378_v1 = vld [vmem:[%s3364_s7] sm:$0xff]  ;;  %s3173_s25 = smov 16   ;;  %s3174_s23 = smov 1   ;;  %v346_v16 = vlaneseq }
  0x59   : > { %v3381_v2 = vld [vmem:[%s3364_s7 + $0x38] sm:$0xff]  ;;  %465 = vrot.lane.b32.xlu1 %v3375_v0, %s3173_s25  ;;  %1128 = vst [vmem:[#allocation2 + $0x110] sm:$0xf] %v3375_v0  ;;  %461 = vrot.lane.b32.xlu0 %v3378_v1, %s3173_s25  ;;  %1126 = vst [vmem:[#allocation2 + $0x100] sm:$0xf] %v3378_v1  ;;  %v3391_v3 = vcombine.high %v3375_v0, %v3375_v0  ;;  %v3395_v4 = vcombine.high %v3378_v1, %v3378_v1  ;;  %v3403_v6 = vld [vmem:[%s3364_s7 + $0x10] sm:$0xff] }
  0x5a   : > { %v3399_v5 = vcombine.high %v3381_v2, %v3381_v2  ;;  %1140 = vst [vmem:[#allocation2 + $0x170] sm:$0xf] %v3381_v2  ;;  %v3406_v7 = vld [vmem:[%s3364_s7 + $0x18] sm:$0xff]  ;;  %1130 = vst [vmem:[#allocation2 + $0x120] sm:$0xf] %v3403_v6  ;;  %v3412_v8 = vcombine.high %v3403_v6, %v3403_v6  ;;  %v3419_v10 = vld [vmem:[%s3364_s7 + $0x20] sm:$0xff] }
  0x5b   : > { %1132 = vst [vmem:[#allocation2 + $0x130] sm:$0xf] %v3406_v7  ;;  %v3416_v9 = vcombine.high %v3406_v7, %v3406_v7  ;;  %1129 = vst [vmem:[#allocation2 + $0x118] sm:$0xf] %v3391_v3  ;;  %v3433_v11 = vcombine.high %v3419_v10, %v3419_v10  ;;  %v3441_v12 = vld [vmem:[%s3364_s7 + $0x28] sm:$0xff]  ;;  %s3175_s27 = smov 17  }
  0x5c   : > { %1127 = vst [vmem:[#allocation2 + $0x108] sm:$0xf] %v3395_v4  ;;  %1141 = vst [vmem:[#allocation2 + $0x178] sm:$0xf] %v3399_v5  ;;  %v3445_v13 = vcombine.high %v3441_v12, %v3441_v12  ;;  %s3176_s13 = smov 15   ;;  %s3177_s14 = smov 127  }
  0x5d   : > { %1134 = vst [vmem:[#allocation2 + $0x140] sm:$0xf] %v3419_v10  ;;  %1131 = vst [vmem:[#allocation2 + $0x128] sm:$0xf] %v3412_v8  ;;  %467 = vrot.lane.b32.xlu1 %v3391_v3, %s3173_s25  ;;  %885 = vrot.lane.b32.xlu0 %v3378_v1, %s3174_s23  ;;  %s3178_s21 = smov 112   ;;  %v3494_v14 = vld [vmem:[%s3364_s7 + $0x30] sm:$0xff] }
  0x5e   : > { %1133 = vst [vmem:[#allocation2 + $0x138] sm:$0xf] %v3416_v9  ;;  %1135 = vst [vmem:[#allocation2 + $0x148] sm:$0xf] %v3433_v11  ;;  %s3179_s6 = smov 113   ;;  %v3515_v15 = vcombine.high %v3494_v14, %v3494_v14  ;;  %s3180_s11 = smov 111  }
  0x5f   : > { %1136 = vst [vmem:[#allocation2 + $0x150] sm:$0xf] %v3441_v12  ;;  %1137 = vst [vmem:[#allocation2 + $0x158] sm:$0xf] %v3445_v13  ;;  %v3558_v17 = vshrl.u32 %v346_v16, 7  ;;  %v3181_v20 = vmov 0.0  }
  0x60   : > { %1138 = vst [vmem:[#allocation2 + $0x160] sm:$0xf] %v3494_v14  ;;  %1139 = vst [vmem:[#allocation2 + $0x168] sm:$0xf] %v3515_v15  ;;  %2194 = vmatprep.mubr.f32.mxu0 %v3181_v20  ;;  %2265 = vmatprep.mubr.f32.mxu1 %v3181_v20  ;;  %vm491_vm0 = vcmask 130048   ;;  %vm915_vm1 = vcmask 7168  }
  0x61   : > { %887 = vrot.lane.b32.xlu1 %v3395_v4, %s3174_s23  ;;  %463 = vrot.lane.b32.xlu0 %v3395_v4, %s3173_s25  ;;  %v525_v18 = vld [vmem:[#allocation6 + $0x1] ss:$8 sm:$0xf]  ;;  %v3567_v21 = vsub.s32 3, %v3558_v17  ;;  %v3572_v27 = vsub.s32 1, %v3558_v17  ;;  %v3583_v30 = vsub.s32 2, %v3558_v17 }
  0x62   : > { %v526_v19 = vld [vmem:[#allocation6 + $0x1] ss:$8 sm:$0xf0]  ;;  %v949_v23 = vld [vmem:[#allocation6 + $0x3] ss:$8 sm:$0xf] }
  0x63   : > { %v3569_v22 = vor.u32 %v526_v19, %v525_v18  ;;  %v950_v24 = vld [vmem:[#allocation6 + $0x3] ss:$8 sm:$0xf0]  ;;  %v3602_v42 = vsub.s32 0, %v3558_v17  ;;  %vm304_vm2 = vcmask 138240   ;;  %vm727_vm3 = vcmask 121856  }
  0x64   : > { %v3580_v29 = vor.u32 %v950_v24, %v949_v23  ;;  %v337_v50 = vld [vmem:[#allocation6] ss:$8 sm:$0xf]  ;;  %v761_v24 = vld [vmem:[#allocation6 + $0x2] ss:$8 sm:$0xf] }
  0x65   : > { %891 = vrot.lane.b32.xlu1 %v3391_v3, %s3174_s23  ;;  %889 = vrot.lane.b32.xlu0 %v3375_v0, %s3174_s23  ;;  %v549_v28 = vrot.slane %v3569_v22, %v3567_v21  ;;  %v541_v34 = vrot.slane %v3569_v22, %v3572_v27  ;;  %v545_v37 = vrot.slane %v3569_v22, %v3583_v30  ;;  %v338_v51 = vld [vmem:[#allocation6] ss:$8 sm:$0xf0]  ;;  %vm1174_vm4 = vcmask 1039360   ;;  %s2836_s7 = sshll.u32 %s3360_s22, 7 }
  0x66   : > { %v965_v36 = vrot.slane %v3580_v29, %v3572_v27  ;;  %v969_v41 = vrot.slane %v3580_v29, %v3583_v30  ;;  %v973_v46 = vrot.slane %v3580_v29, %v3567_v21  ;;  %v961_v59 = vrot.slane %v3580_v29, %v3602_v42 }
  0x67   : > { %v537_v60 = vrot.slane %v3569_v22, %v3602_v42  ;;  %v3626_v63 = vor.u32 %v338_v51, %v337_v50  ;;  %vm1598_vm5 = vcmask 916480   ;;  %vm1410_vm6 = vcmask 924672  }
  0x68   : > { %vm1834_vm7 = vcmask 908288   ;;  %vm2081_vm8 = vcmask 1043456   ;;  %vm2077_vm9 = vcmask 293888  }
  0x69   : > { %882 = vrot.lane.b32.xlu1 %v3399_v5, %s3174_s23  ;;  %458 = vrot.lane.b32.xlu0 %v3399_v5, %s3173_s25  ;;  %v353_v23 = vrot.slane %v3626_v63, %v3572_v27 }
  0x6d   : > { %276 = vrot.lane.b32.xlu1 %v3395_v4, %s3175_s27  ;;  %274 = vrot.lane.b32.xlu0 %v3378_v1, %s3175_s27 }
  0x71   : > { %280 = vrot.lane.b32.xlu1 %v3391_v3, %s3175_s27  ;;  %278 = vrot.lane.b32.xlu0 %v3375_v0, %s3175_s27 }
  0x75   : > { %699 = vrot.lane.b32.xlu1 %v3395_v4, %s3176_s13  ;;  %697 = vrot.lane.b32.xlu0 %v3378_v1, %s3176_s13 }
  0x79   : > { %703 = vrot.lane.b32.xlu1 %v3391_v3, %s3176_s13  ;;  %701 = vrot.lane.b32.xlu0 %v3375_v0, %s3176_s13 }
  0x7d   : > { %694 = vrot.lane.b32.xlu1 %v3399_v5, %s3176_s13  ;;  %257 = vrot.lane.b32.xlu0 %v3399_v5, %s3175_s27 }
  0x81   : > { %1146 = vrot.lane.b32.xlu1 %v3375_v0, %s3177_s14  ;;  %1144 = vrot.lane.b32.xlu0 %v3395_v4, %s3177_s14 }
  0x85   : > { %1150 = vrot.lane.b32.xlu1 %v3403_v6, %s3177_s14  ;;  %1148 = vrot.lane.b32.xlu0 %v3391_v3, %s3177_s14 }
  0x89   : > { %1570 = vrot.lane.b32.xlu1 %v3375_v0, %s3178_s21  ;;  %1568 = vrot.lane.b32.xlu0 %v3395_v4, %s3178_s21 }
  0x8d   : > { %1574 = vrot.lane.b32.xlu1 %v3403_v6, %s3178_s21  ;;  %1572 = vrot.lane.b32.xlu0 %v3391_v3, %s3178_s21 }
  0x91   : > { %1566 = vrot.lane.b32.xlu1 %v3378_v1, %s3178_s21  ;;  %1142 = vrot.lane.b32.xlu0 %v3378_v1, %s3177_s14 }
  0x95   : > { %1382 = vrot.lane.b32.xlu1 %v3375_v0, %s3179_s6  ;;  %1380 = vrot.lane.b32.xlu0 %v3395_v4, %s3179_s6 }
  0x99   : > { %1386 = vrot.lane.b32.xlu1 %v3403_v6, %s3179_s6  ;;  %1384 = vrot.lane.b32.xlu0 %v3391_v3, %s3179_s6 }
  0x9d   : > { %469 = vrot.lane.b32.xlu1 %v3403_v6, %s3173_s25  ;;  %1378 = vrot.lane.b32.xlu0 %v3378_v1, %s3179_s6 }
  0xa1   : > { %473 = vrot.lane.b32.xlu1 %v3406_v7, %s3173_s25  ;;  %471 = vrot.lane.b32.xlu0 %v3412_v8, %s3173_s25 }
  0xa5   : > { %893 = vrot.lane.b32.xlu1 %v3403_v6, %s3174_s23  ;;  %475 = vrot.lane.b32.xlu0 %v3416_v9, %s3173_s25 }
  0xa9   : > { %897 = vrot.lane.b32.xlu1 %v3406_v7, %s3174_s23  ;;  %895 = vrot.lane.b32.xlu0 %v3412_v8, %s3174_s23 }
  0xad   : > { %282 = vrot.lane.b32.xlu1 %v3403_v6, %s3175_s27  ;;  %899 = vrot.lane.b32.xlu0 %v3416_v9, %s3174_s23 }
  0xb1   : > { %286 = vrot.lane.b32.xlu1 %v3406_v7, %s3175_s27  ;;  %284 = vrot.lane.b32.xlu0 %v3412_v8, %s3175_s27 }
  0xb5   : > { %705 = vrot.lane.b32.xlu1 %v3403_v6, %s3176_s13  ;;  %288 = vrot.lane.b32.xlu0 %v3416_v9, %s3175_s27 }
  0xb9   : > { %709 = vrot.lane.b32.xlu1 %v3406_v7, %s3176_s13  ;;  %707 = vrot.lane.b32.xlu0 %v3412_v8, %s3176_s13 }
  0xbd   : > { %1804 = vrot.lane.b32.xlu1 %v3395_v4, %s3180_s11  ;;  %711 = vrot.lane.b32.xlu0 %v3416_v9, %s3176_s13 }
  0xc1   : > { %1808 = vrot.lane.b32.xlu1 %v3391_v3, %s3180_s11  ;;  %1806 = vrot.lane.b32.xlu0 %v3375_v0, %s3180_s11 }
  0xc5   : > { %1802 = vrot.lane.b32.xlu1 %v3378_v1, %s3180_s11  ;;  %1810 = vrot.lane.b32.xlu0 %v3403_v6, %s3180_s11 }
  0xc9   : > { %1154 = vrot.lane.b32.xlu1 %v3406_v7, %s3177_s14  ;;  %1152 = vrot.lane.b32.xlu0 %v3412_v8, %s3177_s14 }
  0xcb   : > { %v466_v25 = vpop.permute.xlu1 %465  ;;  %v462_v26 = vpop.permute.xlu0 %461 }
  0xcd   : > { %1158 = vrot.lane.b32.xlu1 %v3419_v10, %s3177_s14  ;;  %1156 = vrot.lane.b32.xlu0 %v3416_v9, %s3177_s14 }
  0xcf   : > { %v3585_v31 = vpop.permute.xlu1 %467  ;;  %v886_v32 = vpop.permute.xlu0 %885 }
  0xd0   : > { %v494_v33 = vsel %vm491_vm0, %v466_v25, %v3585_v31 }
  0xd1   : > { %v617_v35 = vmul.f32 %v549_v28, %v494_v33  ;;  %1578 = vrot.lane.b32.xlu1 %v3406_v7, %s3178_s21  ;;  %1576 = vrot.lane.b32.xlu0 %v3412_v8, %s3178_s21 }
  0xd3   : > { %v649_v38 = vrot.slane %v617_v35, 4  ;;  %v888_v39 = vpop.permute.xlu1 %887  ;;  %v464_v40 = vpop.permute.xlu0 %463  ;;  %v357_v35 = vrot.slane %v3626_v63, %v3583_v30 }
  0xd4   : > { %v916_v43 = vsel %vm915_vm1, %v886_v32, %v888_v39  ;;  %v492_v44 = vsel %vm491_vm0, %v462_v26, %v464_v40  ;;  %v493_v45 = vsel %vm491_vm0, %v464_v40, %v466_v25  ;;  %v762_v25 = vld [vmem:[#allocation6 + $0x2] ss:$8 sm:$0xf0] }
  0xd5   : > { %681 = vst [vmem:[#allocation2 + $0x18] sm:$0xf0] %v649_v38  ;;  %v1039_v47 = vmul.f32 %v965_v36, %v916_v43  ;;  %v615_v48 = vmul.f32 %v541_v34, %v492_v44  ;;  %v616_v49 = vmul.f32 %v545_v37, %v493_v45  ;;  %1582 = vrot.lane.b32.xlu1 %v3419_v10, %s3178_s21 }
  0xd6   : > { %1580 = vrot.lane.b32.xlu0 %v3416_v9, %s3178_s21  ;;  %v361_v37 = vrot.slane %v3626_v63, %v3567_v21  ;;  %v3651_v38 = vor.u32 %v762_v25, %v761_v24 }
  0xd7   : > { %v1071_v52 = vrot.slane %v1039_v47, 4  ;;  %v647_v53 = vrot.slane %v615_v48, 4  ;;  %v648_v54 = vrot.slane %v616_v49, 4  ;;  %v3613_v55 = vpop.permute.xlu1 %891  ;;  %v890_v56 = vpop.permute.xlu0 %889 }
  0xd8   : > { %v917_v57 = vsel %vm915_vm1, %v888_v39, %v890_v56  ;;  %v918_v58 = vsel %vm915_vm1, %v890_v56, %v3613_v55  ;;  %v781_v51 = vrot.slane %v3651_v38, %v3583_v30 }
  0xd9   : > { %1103 = vst [vmem:[#allocation2 + $0x88] sm:$0xf0] %v1071_v52  ;;  %679 = vst [vmem:[#allocation2 + $0x8] sm:$0xf0] %v647_v53  ;;  %v1040_v61 = vmul.f32 %v969_v41, %v917_v57  ;;  %v1041_v62 = vmul.f32 %v973_v46, %v918_v58  ;;  %1390 = vrot.lane.b32.xlu1 %v3406_v7, %s3179_s6  ;;  %v777_v46 = vrot.slane %v3651_v38, %v3572_v27 }
  0xda   : > { %680 = vst [vmem:[#allocation2 + $0x10] sm:$0xf0] %v648_v54  ;;  %1388 = vrot.lane.b32.xlu0 %v3412_v8, %s3179_s6  ;;  %v785_v52 = vrot.slane %v3651_v38, %v3567_v21  ;;  %v1209_v53 = vld [vmem:[#allocation6 + $0x4] ss:$8 sm:$0xf] }
  0xdb   : > { %v1072_v0 = vrot.slane %v1040_v61, 4  ;;  %v1073_v1 = vrot.slane %v1041_v62, 4  ;;  %v3628_v3 = vpop.permute.xlu1 %882  ;;  %v3630_v4 = vpop.permute.xlu0 %458  ;;  %v1210_v54 = vld [vmem:[#allocation6 + $0x4] ss:$8 sm:$0xf0]  ;;  %v349_v61 = vrot.slane %v3626_v63, %v3602_v42 }
  0xdc   : > { %v947_v6 = vsel %vm915_vm1, %v3628_v3, %v886_v32  ;;  %v523_v16 = vsel %vm491_vm0, %v3630_v4, %v462_v26 }
  0xdd   : > { %1104 = vst [vmem:[#allocation2 + $0x90] sm:$0xf0] %v1072_v0  ;;  %1105 = vst [vmem:[#allocation2 + $0x98] sm:$0xf0] %v1073_v1  ;;  %v1038_v18 = vmul.f32 %v961_v59, %v947_v6  ;;  %v614_v19 = vmul.f32 %v537_v60, %v523_v16  ;;  %1394 = vrot.lane.b32.xlu1 %v3419_v10, %s3179_s6  ;;  %v773_v60 = vrot.slane %v3651_v38, %v3602_v42 }
  0xde   : > { %1392 = vrot.lane.b32.xlu0 %v3416_v9, %s3179_s6  ;;  %v3686_v1 = vor.u32 %v1210_v54, %v1209_v53 }
  0xdf   : > { %v1070_v28 = vrot.slane %v1038_v18, 4  ;;  %v646_v32 = vrot.slane %v614_v19, 4  ;;  %v277_v33 = vpop.permute.xlu1 %276  ;;  %v275_v26 = vpop.permute.xlu0 %274 }
  0xe0   : > { %v305_v34 = vsel %vm304_vm2, %v275_v26, %v277_v33  ;;  %v1225_v25 = vrot.slane %v3686_v1, %v3572_v27 }
  0xe1   : > { %1102 = vst [vmem:[#allocation2 + $0x80] sm:$0xf0] %v1070_v28  ;;  %678 = vst [vmem:[#allocation2] sm:$0xf0] %v646_v32  ;;  %v427_v36 = vmul.f32 %v353_v23, %v305_v34  ;;  %479 = vrot.lane.b32.xlu1 %v3433_v11, %s3173_s25 }
  0xe2   : > { %477 = vrot.lane.b32.xlu0 %v3419_v10, %s3173_s25  ;;  %v1633_v28 = vld [vmem:[#allocation6 + $0x6] ss:$8 sm:$0xf] }
  0xe3   : > { %443 = vst [vmem:[#allocation2 + $0x8] sm:$0xf] %v427_v36  ;;  %v3653_v39 = vpop.permute.xlu1 %280  ;;  %v279_v40 = vpop.permute.xlu0 %278  ;;  %v1634_v34 = vld [vmem:[#allocation6 + $0x6] ss:$8 sm:$0xf0] }
  0xe4   : > { %v306_v41 = vsel %vm304_vm2, %v277_v33, %v279_v40  ;;  %v307_v43 = vsel %vm304_vm2, %v279_v40, %v3653_v39  ;;  %v1229_v40 = vrot.slane %v3686_v1, %v3583_v30 }
  0xe5   : > { %v428_v44 = vmul.f32 %v357_v35, %v306_v41  ;;  %v429_v45 = vmul.f32 %v361_v37, %v307_v43  ;;  %483 = vrot.lane.b32.xlu1 %v3445_v13, %s3173_s25  ;;  %v1233_v43 = vrot.slane %v3686_v1, %v3567_v21 }
  0xe6   : > { %481 = vrot.lane.b32.xlu0 %v3441_v12, %s3173_s25 }
  0xe7   : > { %444 = vst [vmem:[#allocation2 + $0x10] sm:$0xf] %v428_v44  ;;  %445 = vst [vmem:[#allocation2 + $0x18] sm:$0xf] %v429_v45  ;;  %v700_v47 = vpop.permute.xlu1 %699  ;;  %v698_v48 = vpop.permute.xlu0 %697  ;;  %v3714_v45 = vor.u32 %v1634_v34, %v1633_v28 }
  0xe8   : > { %v728_v49 = vsel %vm727_vm3, %v698_v48, %v700_v47  ;;  %v1445_v34 = vld [vmem:[#allocation6 + $0x5] ss:$8 sm:$0xf] }
  0xe9   : > { %v851_v50 = vmul.f32 %v777_v46, %v728_v49  ;;  %903 = vrot.lane.b32.xlu1 %v3433_v11, %s3174_s23 }
  0xea   : > { %901 = vrot.lane.b32.xlu0 %v3419_v10, %s3174_s23  ;;  %v1992_v32 = vld [vmem:[#allocation2 + $0x8] sm:$0xff] }
  0xeb   : > { %867 = vst [vmem:[#allocation2 + $0x88] sm:$0xf] %v851_v50  ;;  %v3673_v56 = vpop.permute.xlu1 %703  ;;  %v702_v57 = vpop.permute.xlu0 %701 }
  0xec   : > { %v729_v58 = vsel %vm727_vm3, %v700_v47, %v702_v57  ;;  %v730_v59 = vsel %vm727_vm3, %v702_v57, %v3673_v56 }
  0xed   : > { %v852_v62 = vmul.f32 %v781_v51, %v729_v58  ;;  %v853_v0 = vmul.f32 %v785_v52, %v730_v59  ;;  %907 = vrot.lane.b32.xlu1 %v3445_v13, %s3174_s23 }
  0xee   : > { %905 = vrot.lane.b32.xlu0 %v3441_v12, %s3174_s23  ;;  %v1994_v44 = vld [vmem:[#allocation2 + $0x18] sm:$0xff]  ;;  %v1993_v47 = vld [vmem:[#allocation2 + $0x10] sm:$0xff] }
  0xef   : > { %868 = vst [vmem:[#allocation2 + $0x90] sm:$0xf] %v852_v62  ;;  %869 = vst [vmem:[#allocation2 + $0x98] sm:$0xf] %v853_v0  ;;  %v3688_v6 = vpop.permute.xlu1 %694  ;;  %v3690_v16 = vpop.permute.xlu0 %257 }
  0xf0   : > { %v759_v18 = vsel %vm727_vm3, %v3688_v6, %v698_v48  ;;  %v336_v19 = vsel %vm304_vm2, %v3690_v16, %v275_v26 }
  0xf1   : > { %v850_v23 = vmul.f32 %v773_v60, %v759_v18  ;;  %v426_v24 = vmul.f32 %v349_v61, %v336_v19  ;;  %292 = vrot.lane.b32.xlu1 %v3433_v11, %s3175_s27  ;;  %v1649_v60 = vrot.slane %v3714_v45, %v3572_v27 }
  0xf2   : > { %290 = vrot.lane.b32.xlu0 %v3419_v10, %s3175_s27  ;;  %v2008_v33 = vld [vmem:[#allocation2 + $0x88] sm:$0xff] }
  0xf3   : > { %866 = vst [vmem:[#allocation2 + $0x80] sm:$0xf] %v850_v23  ;;  %442 = vst [vmem:[#allocation2] sm:$0xf] %v426_v24  ;;  %v1147_v35 = vpop.permute.xlu1 %1146  ;;  %v3702_v26 = vpop.permute.xlu0 %1144  ;;  %v2868_v36 = vpack.c.bf16 %v2008_v33, %v1992_v32  ;;  %v1653_v32 = vrot.slane %v3714_v45, %v3583_v30  ;;  %v1657_v33 = vrot.slane %v3714_v45, %v3567_v21 }
  0xf4   : > { %v1176_v37 = vsel %vm1174_vm4, %v3702_v26, %v1147_v35 }
  0xf5   : > { %v1299_v41 = vmul.f32 %v1225_v25, %v1176_v37  ;;  %296 = vrot.lane.b32.xlu1 %v3445_v13, %s3175_s27  ;;  %2869 = vmatprep.subr.bf16.mxu0 %v2868_v36 }
  0xf6   : > { %294 = vrot.lane.b32.xlu0 %v3441_v12, %s3175_s27  ;;  %v2010_v46 = vld [vmem:[#allocation2 + $0x98] sm:$0xff]  ;;  %v2009_v48 = vld [vmem:[#allocation2 + $0x90] sm:$0xff] }
  0xf7   : > { %v1331_v49 = vrot.slane %v1299_v41, 4  ;;  %v3716_v50 = vpop.permute.xlu1 %1150  ;;  %v1149_v51 = vpop.permute.xlu0 %1148  ;;  %v2876_v52 = vpack.c.bf16 %v2010_v46, %v1994_v44  ;;  %v2878_v53 = vpack.c.bf16 %v2009_v48, %v1993_v47  ;;  %v1645_v44 = vrot.slane %v3714_v45, %v3602_v42 }
  0xf8   : > { %v1177_v54 = vsel %vm1174_vm4, %v1147_v35, %v1149_v51  ;;  %v1178_v57 = vsel %vm1174_vm4, %v1149_v51, %v3716_v50  ;;  %v1446_v35 = vld [vmem:[#allocation6 + $0x5] ss:$8 sm:$0xf0]  ;;  %v1221_v46 = vrot.slane %v3686_v1, %v3602_v42 }
  0xf9   : > { %1363 = vst [vmem:[#allocation2 + $0x108] sm:$0xf0] %v1331_v49  ;;  %v1300_v58 = vmul.f32 %v1229_v40, %v1177_v54  ;;  %v1301_v59 = vmul.f32 %v1233_v43, %v1178_v57  ;;  %715 = vrot.lane.b32.xlu1 %v3433_v11, %s3176_s13  ;;  %2877 = vmatprep.subr.bf16.mxu1 %v2876_v52 }
  0xfa   : > { %713 = vrot.lane.b32.xlu0 %v3419_v10, %s3176_s13  ;;  %v1991_v61 = vld [vmem:[#allocation2] sm:$0xff]  ;;  %2879 = vmatpush1.bf16.msra.mxu1 %v2878_v53  ;;  %v3749_v49 = vor.u32 %v1446_v35, %v1445_v34 }
  0xfb   : > { %v2007_v62 = vld [vmem:[#allocation2 + $0x80] sm:$0xff]  ;;  %v1332_v0 = vrot.slane %v1300_v58, 4  ;;  %v1333_v18 = vrot.slane %v1301_v59, 4  ;;  %v1571_v19 = vpop.permute.xlu1 %1570  ;;  %v1569_v23 = vpop.permute.xlu0 %1568 }
  0xfc   : > { %v2870_v24 = vpack.c.bf16 %v2007_v62, %v1991_v61  ;;  %v1600_v25 = vsel %vm1598_vm5, %v1569_v23, %v1571_v19 }
  0xfd   : > { %1364 = vst [vmem:[#allocation2 + $0x110] sm:$0xf0] %v1332_v0  ;;  %1365 = vst [vmem:[#allocation2 + $0x118] sm:$0xf0] %v1333_v18  ;;  %v1723_v28 = vmul.f32 %v1649_v60, %v1600_v25  ;;  %719 = vrot.lane.b32.xlu1 %v3445_v13, %s3176_s13  ;;  %v3768_v18 = vsub.s32 4, %v3558_v17 }
  0xfe   : > { %717 = vrot.lane.b32.xlu0 %v3441_v12, %s3176_s13  ;;  %2871 = vmatpush1.bf16.msra.mxu0 %v2870_v24 }
  0xff   : > { %v1755_v36 = vrot.slane %v1723_v28, 4  ;;  %v3736_v37 = vpop.permute.xlu1 %1574  ;;  %v1573_v40 = vpop.permute.xlu0 %1572 }
 0x100   : > { %v1601_v41 = vsel %vm1598_vm5, %v1571_v19, %v1573_v40  ;;  %v1602_v43 = vsel %vm1598_vm5, %v1573_v40, %v3736_v37  ;;  %v3795_v40 = vsub.s32 6, %v3558_v17 }
 0x101   : > { %1787 = vst [vmem:[#allocation2 + $0x188] sm:$0xf0] %v1755_v36  ;;  %v1724_v47 = vmul.f32 %v1653_v32, %v1601_v41  ;;  %v1725_v48 = vmul.f32 %v1657_v33, %v1602_v43  ;;  %1814 = vrot.lane.b32.xlu1 %v3406_v7, %s3180_s11  ;;  %v553_v32 = vrot.slane %v3569_v22, %v3768_v18  ;;  %v3786_v33 = vsub.s32 5, %v3558_v17 }
 0x102   : > { %1812 = vrot.lane.b32.xlu0 %v3412_v8, %s3180_s11  ;;  %v1461_v8 = vrot.slane %v3749_v49, %v3572_v27  ;;  %v1457_v36 = vrot.slane %v3749_v49, %v3602_v42 }
 0x103   : > { %v1756_v51 = vrot.slane %v1724_v47, 4  ;;  %v1757_v52 = vrot.slane %v1725_v48, 4  ;;  %v3751_v53 = vpop.permute.xlu1 %1566  ;;  %v3753_v54 = vpop.permute.xlu0 %1142  ;;  %v557_v47 = vrot.slane %v3569_v22, %v3786_v33 }
 0x104   : > { %v1599_v57 = vsel %vm1598_vm5, %v3751_v53, %v1569_v23  ;;  %v1175_v58 = vsel %vm1174_vm4, %v3753_v54, %v3702_v26 }
 0x105   : > { %1788 = vst [vmem:[#allocation2 + $0x190] sm:$0xf0] %v1756_v51  ;;  %1789 = vst [vmem:[#allocation2 + $0x198] sm:$0xf0] %v1757_v52  ;;  %v1722_v7 = vmul.f32 %v1645_v44, %v1599_v57  ;;  %v1298_v59 = vmul.f32 %v1221_v46, %v1175_v58  ;;  %1818 = vrot.lane.b32.xlu1 %v3419_v10, %s3180_s11  ;;  %v1469_v10 = vrot.slane %v3749_v49, %v3567_v21 }
 0x106   : > { %1816 = vrot.lane.b32.xlu0 %v3416_v9, %s3180_s11  ;;  %v1465_v9 = vrot.slane %v3749_v49, %v3583_v30  ;;  %v561_v52 = vrot.slane %v3569_v22, %v3795_v40  ;;  %v3812_v57 = vsub.s32 7, %v3558_v17 }
 0x107   : > { %v1754_v60 = vrot.slane %v1722_v7, 4  ;;  %v1330_v61 = vrot.slane %v1298_v59, 4  ;;  %v1383_v62 = vpop.permute.xlu1 %1382  ;;  %v1381_v0 = vpop.permute.xlu0 %1380 }
 0x108   : > { %v1412_v26 = vsel %vm1410_vm6, %v1381_v0, %v1383_v62  ;;  %v565_v17 = vrot.slane %v3569_v22, %v3812_v57  ;;  %v981_v22 = vrot.slane %v3580_v29, %v3786_v33 }
 0x109   : > { %1786 = vst [vmem:[#allocation2 + $0x180] sm:$0xf0] %v1754_v60  ;;  %1362 = vst [vmem:[#allocation2 + $0x100] sm:$0xf0] %v1330_v61  ;;  %v1535_v19 = vmul.f32 %v1461_v8, %v1412_v26  ;;  %1162 = vrot.lane.b32.xlu1 %v3441_v12, %s3177_s14 }
 0x10a   : > { %1160 = vrot.lane.b32.xlu0 %v3433_v11, %s3177_s14 }
 0x10b   : > { %1551 = vst [vmem:[#allocation2 + $0x188] sm:$0xf] %v1535_v19  ;;  %v3778_v23 = vpop.permute.xlu1 %1386  ;;  %v1385_v24 = vpop.permute.xlu0 %1384 }
 0x10c   : > { %v1413_v25 = vsel %vm1410_vm6, %v1383_v62, %v1385_v24  ;;  %v1414_v28 = vsel %vm1410_vm6, %v1385_v24, %v3778_v23  ;;  %v2025_v24 = vld [vmem:[#allocation2 + $0x110] sm:$0xff] }
 0x10d   : > { %v1536_v34 = vmul.f32 %v1465_v9, %v1413_v25  ;;  %v1537_v35 = vmul.f32 %v1469_v10, %v1414_v28  ;;  %1166 = vrot.lane.b32.xlu1 %v3494_v14, %s3177_s14  ;;  %v2026_v9 = vld [vmem:[#allocation2 + $0x118] sm:$0xff] }
 0x10e   : > { %1164 = vrot.lane.b32.xlu0 %v3445_v13, %s3177_s14 }
 0x10f   : > { %1552 = vst [vmem:[#allocation2 + $0x190] sm:$0xf] %v1536_v34  ;;  %1553 = vst [vmem:[#allocation2 + $0x198] sm:$0xf] %v1537_v35  ;;  %v470_v41 = vpop.permute.xlu1 %469  ;;  %v3797_v43 = vpop.permute.xlu0 %1378 }
 0x110   : > { %v495_v44 = vsel %vm491_vm0, %v3585_v31, %v470_v41  ;;  %v1411_v46 = vsel %vm1410_vm6, %v3797_v43, %v1381_v0  ;;  %v2024_v31 = vld [vmem:[#allocation2 + $0x108] sm:$0xff]  ;;  %v977_v0 = vrot.slane %v3580_v29, %v3768_v18 }
 0x111   : > { %v618_v48 = vmul.f32 %v553_v32, %v495_v44  ;;  %v1534_v51 = vmul.f32 %v1457_v36, %v1411_v46  ;;  %1586 = vrot.lane.b32.xlu1 %v3441_v12, %s3178_s21 }
 0x112   : > { %1584 = vrot.lane.b32.xlu0 %v3433_v11, %s3178_s21  ;;  %v2040_v58 = vld [vmem:[#allocation2 + $0x188] sm:$0xff] }
 0x113   : > { %v650_v7 = vrot.slane %v618_v48, 4  ;;  %1550 = vst [vmem:[#allocation2 + $0x180] sm:$0xf] %v1534_v51  ;;  %v474_v59 = vpop.permute.xlu1 %473  ;;  %v472_v8 = vpop.permute.xlu0 %471  ;;  %v2872_v60 = vpack.c.bf16 %v2040_v58, %v2024_v31  ;;  %v985_v51 = vrot.slane %v3580_v29, %v3795_v40 }
 0x114   : > { %v496_v61 = vsel %vm491_vm0, %v470_v41, %v472_v8  ;;  %v497_v62 = vsel %vm491_vm0, %v472_v8, %v474_v59 }
 0x115   : > { %682 = vst [vmem:[#allocation2 + $0x20] sm:$0xf0] %v650_v7  ;;  %v619_v26 = vmul.f32 %v557_v47, %v496_v61  ;;  %v620_v19 = vmul.f32 %v561_v52, %v497_v62  ;;  %1590 = vrot.lane.b32.xlu1 %v3494_v14, %s3178_s21  ;;  %2873 = vmatprep.subr.bf16.mxu0 %v2872_v60 }
 0x116   : > { %1588 = vrot.lane.b32.xlu0 %v3445_v13, %s3178_s21  ;;  %v2042_v10 = vld [vmem:[#allocation2 + $0x198] sm:$0xff]  ;;  %v2041_v25 = vld [vmem:[#allocation2 + $0x190] sm:$0xff]  ;;  %v365_v62 = vrot.slane %v3626_v63, %v3768_v18 }
 0x117   : > { %v651_v28 = vrot.slane %v619_v26, 4  ;;  %v652_v32 = vrot.slane %v620_v19, 4  ;;  %v894_v34 = vpop.permute.xlu1 %893  ;;  %v3824_v35 = vpop.permute.xlu0 %475  ;;  %v2880_v36 = vpack.c.bf16 %v2042_v10, %v2026_v9  ;;  %v2882_v41 = vpack.c.bf16 %v2041_v25, %v2025_v24 }
 0x118   : > { %v919_v44 = vsel %vm915_vm1, %v3613_v55, %v894_v34  ;;  %v498_v46 = vsel %vm491_vm0, %v474_v59, %v3824_v35  ;;  %v2023_v55 = vld [vmem:[#allocation2 + $0x100] sm:$0xff]  ;;  %v989_v19 = vrot.slane %v3580_v29, %v3812_v57  ;;  %v373_v29 = vrot.slane %v3626_v63, %v3795_v40 }
 0x119   : > { %683 = vst [vmem:[#allocation2 + $0x28] sm:$0xf0] %v651_v28  ;;  %684 = vst [vmem:[#allocation2 + $0x30] sm:$0xf0] %v652_v32  ;;  %v1042_v47 = vmul.f32 %v977_v0, %v919_v44  ;;  %v621_v48 = vmul.f32 %v565_v17, %v498_v46  ;;  %1398 = vrot.lane.b32.xlu1 %v3441_v12, %s3179_s6  ;;  %2881 = vmatprep.subr.bf16.mxu1 %v2880_v36 }
 0x11a   : > { %1396 = vrot.lane.b32.xlu0 %v3433_v11, %s3179_s6  ;;  %v2039_v52 = vld [vmem:[#allocation2 + $0x180] sm:$0xff]  ;;  %2883 = vmatpush1.bf16.msra.mxu1 %v2882_v41  ;;  %v369_v32 = vrot.slane %v3626_v63, %v3786_v33 }
 0x11b   : > { %v1074_v31 = vrot.slane %v1042_v47, 4  ;;  %v653_v58 = vrot.slane %v621_v48, 4  ;;  %v898_v7 = vpop.permute.xlu1 %897  ;;  %v896_v59 = vpop.permute.xlu0 %895  ;;  %v2874_v8 = vpack.c.bf16 %v2039_v52, %v2023_v55  ;;  %v789_v47 = vrot.slane %v3651_v38, %v3768_v18 }
 0x11c   : > { %v920_v60 = vsel %vm915_vm1, %v894_v34, %v896_v59  ;;  %v921_v61 = vsel %vm915_vm1, %v896_v59, %v898_v7  ;;  %v377_v55 = vrot.slane %v3626_v63, %v3812_v57  ;;  %v793_v59 = vrot.slane %v3651_v38, %v3786_v33 }
 0x11d   : > { %1106 = vst [vmem:[#allocation2 + $0xa0] sm:$0xf0] %v1074_v31  ;;  %685 = vst [vmem:[#allocation2 + $0x38] sm:$0xf0] %v653_v58  ;;  %v1043_v0 = vmul.f32 %v981_v22, %v920_v60  ;;  %v1044_v26 = vmul.f32 %v985_v51, %v921_v61  ;;  %1402 = vrot.lane.b32.xlu1 %v3494_v14, %s3179_s6  ;;  %2875 = vmatpush1.bf16.msra.mxu0 %v2874_v8 }
 0x11e   : > { %1400 = vrot.lane.b32.xlu0 %v3445_v13, %s3179_s6  ;;  %v797_v63 = vrot.slane %v3651_v38, %v3795_v40  ;;  %v1869_v61 = vld [vmem:[#allocation6 + $0x7] ss:$8 sm:$0xf] }
 0x11f   : > { %v1075_v17 = vrot.slane %v1043_v0, 4  ;;  %v1076_v9 = vrot.slane %v1044_v26, 4  ;;  %v283_v10 = vpop.permute.xlu1 %282  ;;  %v3848_v24 = vpop.permute.xlu0 %899 }
 0x120   : > { %v308_v25 = vsel %vm304_vm2, %v3653_v39, %v283_v10  ;;  %v922_v28 = vsel %vm915_vm1, %v898_v7, %v3848_v24 }
 0x121   : > { %1107 = vst [vmem:[#allocation2 + $0xa8] sm:$0xf0] %v1075_v17  ;;  %1108 = vst [vmem:[#allocation2 + $0xb0] sm:$0xf0] %v1076_v9  ;;  %v430_v34 = vmul.f32 %v365_v62, %v308_v25  ;;  %v1045_v36 = vmul.f32 %v989_v19, %v922_v28  ;;  %487 = vrot.lane.b32.xlu1 %v3515_v15, %s3173_s25  ;;  %v801_v17 = vrot.slane %v3651_v38, %v3812_v57 }
 0x122   : > { %485 = vrot.lane.b32.xlu0 %v3494_v14, %s3173_s25  ;;  %v1870_v62 = vld [vmem:[#allocation6 + $0x7] ss:$8 sm:$0xf0] }
 0x123   : > { %446 = vst [vmem:[#allocation2 + $0x20] sm:$0xf] %v430_v34  ;;  %v1077_v39 = vrot.slane %v1045_v36, 4  ;;  %v287_v41 = vpop.permute.xlu1 %286  ;;  %v285_v44 = vpop.permute.xlu0 %284  ;;  %v3894_v25 = vor.u32 %v1870_v62, %v1869_v61 }
 0x124   : > { %v309_v46 = vsel %vm304_vm2, %v283_v10, %v285_v44  ;;  %v310_v22 = vsel %vm304_vm2, %v285_v44, %v287_v41 }
 0x125   : > { %1109 = vst [vmem:[#allocation2 + $0xb8] sm:$0xf0] %v1077_v39  ;;  %v431_v48 = vmul.f32 %v369_v32, %v309_v46  ;;  %v432_v51 = vmul.f32 %v373_v29, %v310_v22  ;;  %909 = vrot.lane.b32.xlu1 %v3494_v14, %s3174_s23  ;;  %v1885_v38 = vrot.slane %v3894_v25, %v3572_v27 }
 0x126   : > { %489 = vrot.lane.b32.xlu0 %v3381_v2, %s3173_s25  ;;  %v1889_v29 = vrot.slane %v3894_v25, %v3583_v30  ;;  %v1881_v22 = vrot.slane %v3894_v25, %v3602_v42  ;;  %s4330_s25 = scalar_lea.vmem [#allocation8], %s2836_s7 }
 0x127   : > { %447 = vst [vmem:[#allocation2 + $0x28] sm:$0xf] %v431_v48  ;;  %448 = vst [vmem:[#allocation2 + $0x30] sm:$0xf] %v432_v51  ;;  %v706_v52 = vpop.permute.xlu1 %705  ;;  %v3872_v31 = vpop.permute.xlu0 %288  ;;  %v1893_v51 = vrot.slane %v3894_v25, %v3567_v21 }
 0x128   : > { %v731_v58 = vsel %vm727_vm3, %v3673_v56, %v706_v52  ;;  %v311_v7 = vsel %vm304_vm2, %v287_v41, %v3872_v31 }
 0x129   : > { %v854_v8 = vmul.f32 %v789_v47, %v731_v58  ;;  %v433_v60 = vmul.f32 %v377_v55, %v311_v7  ;;  %913 = vrot.lane.b32.xlu1 %v3381_v2, %s3174_s23 }
 0x12a   : > { %911 = vrot.lane.b32.xlu0 %v3515_v15, %s3174_s23  ;;  %s2867_s23 = sshll.u32 %s3161_s18, 11  ;;  %s2715_s18 = scalar_lea.sflag [#allocation5], %s3360_s22 }
 0x12b   : > { %870 = vst [vmem:[#allocation2 + $0xa0] sm:$0xf] %v854_v8  ;;  %449 = vst [vmem:[#allocation2 + $0x38] sm:$0xf] %v433_v60  ;;  %v710_v56 = vpop.permute.xlu1 %709  ;;  %v708_v0 = vpop.permute.xlu0 %707 }
 0x12c   : > { %v732_v26 = vsel %vm727_vm3, %v706_v52, %v708_v0  ;;  %v733_v19 = vsel %vm727_vm3, %v708_v0, %v710_v56 }
 0x12d   : > { %v855_v9 = vmul.f32 %v793_v59, %v732_v26  ;;  %v856_v10 = vmul.f32 %v797_v63, %v733_v19  ;;  %300 = vrot.lane.b32.xlu1 %v3515_v15, %s3175_s27  ;;  %v1237_v59 = vrot.slane %v3686_v1, %v3768_v18  ;;  %v1241_v63 = vrot.slane %v3686_v1, %v3786_v33 }
 0x12e   : > { %298 = vrot.lane.b32.xlu0 %v3494_v14, %s3175_s27  ;;  %v1245_v26 = vrot.slane %v3686_v1, %v3795_v40 }
 0x12f   : > { %871 = vst [vmem:[#allocation2 + $0xa8] sm:$0xf] %v855_v9  ;;  %872 = vst [vmem:[#allocation2 + $0xb0] sm:$0xf] %v856_v10  ;;  %v1805_v28 = vpop.permute.xlu1 %1804  ;;  %v3896_v32 = vpop.permute.xlu0 %711 }
 0x130   : > { %v734_v34 = vsel %vm727_vm3, %v710_v56, %v3896_v32 }
 0x131   : > { %v857_v36 = vmul.f32 %v801_v17, %v734_v34  ;;  %721 = vrot.lane.b32.xlu1 %v3494_v14, %s3176_s13 }
 0x132   : > { %302 = vrot.lane.b32.xlu0 %v3381_v2, %s3175_s27  ;;  %s2731_s27 = sshll.u32 %s4330_s25, 4  ;;  %s4353_s27 = int_to_ptr.vmem [resolvable:$true] %s2731_s27 }
 0x133   : > { %873 = vst [vmem:[#allocation2 + $0xb8] sm:$0xf] %v857_v36  ;;  %v1809_v39 = vpop.permute.xlu1 %1808  ;;  %v1807_v41 = vpop.permute.xlu0 %1806 }
 0x134   : > { %v1836_v44 = vsel %vm1834_vm7, %v1805_v28, %v1807_v41  ;;  %v1837_v46 = vsel %vm1834_vm7, %v1807_v41, %v1809_v39  ;;  %v3962_v41 = vld [vmem:[%s4403_s1] sm:$0xff] }
 0x135   : > { %v1959_v47 = vmul.f32 %v1885_v38, %v1836_v44  ;;  %v1960_v48 = vmul.f32 %v1889_v29, %v1837_v46  ;;  %725 = vrot.lane.b32.xlu1 %v3381_v2, %s3176_s13  ;;  %v1665_v29 = vrot.slane %v3714_v45, %v3786_v33 }
 0x136   : > { %723 = vrot.lane.b32.xlu0 %v3515_v15, %s3176_s13  ;;  %v2012_v34 = vld [vmem:[#allocation2 + $0xa8] sm:$0xff] }
 0x137   : > { %1975 = vst [vmem:[#allocation2 + $0x208] sm:$0xf] %v1959_v47  ;;  %1976 = vst [vmem:[#allocation2 + $0x210] sm:$0xf] %v1960_v48  ;;  %v3918_v55 = vpop.permute.xlu1 %1802  ;;  %v3920_v52 = vpop.permute.xlu0 %1810  ;;  %v2011_v48 = vld [vmem:[#allocation2 + $0xa0] sm:$0xff] }
 0x138   : > { %v1835_v58 = vsel %vm1834_vm7, %v3918_v55, %v1805_v28  ;;  %v1838_v7 = vsel %vm1834_vm7, %v1809_v39, %v3920_v52  ;;  %v1996_v39 = vld [vmem:[#allocation2 + $0x28] sm:$0xff] }
 0x139   : > { %v1958_v8 = vmul.f32 %v1881_v22, %v1835_v58  ;;  %v1961_v60 = vmul.f32 %v1893_v51, %v1838_v7  ;;  %1822 = vrot.lane.b32.xlu1 %v3441_v12, %s3180_s11  ;;  %v2884_v47 = vpack.c.bf16 %v2012_v34, %v1996_v39  ;;  %v529_v39 = vld [vmem:[#allocation6 + $0x41] ss:$8 sm:$0xf] }
 0x13a   : > { %1820 = vrot.lane.b32.xlu0 %v3433_v11, %s3180_s11  ;;  %v1249_v11 = vrot.slane %v3686_v1, %v3812_v57  ;;  %v2014_v44 = vld [vmem:[#allocation2 + $0xb8] sm:$0xff] }
 0x13b   : > { %1974 = vst [vmem:[#allocation2 + $0x200] sm:$0xf] %v1958_v8  ;;  %1977 = vst [vmem:[#allocation2 + $0x218] sm:$0xf] %v1961_v60  ;;  %v1155_v61 = vpop.permute.xlu1 %1154  ;;  %v1153_v62 = vpop.permute.xlu0 %1152  ;;  %v1998_v60 = vld [vmem:[#allocation2 + $0x38] sm:$0xff] }
 0x13c   : > { %v1179_v56 = vsel %vm1174_vm4, %v3716_v50, %v1153_v62  ;;  %v1180_v0 = vsel %vm1174_vm4, %v1153_v62, %v1155_v61  ;;  %v1673_v62 = vrot.slane %v3714_v45, %v3812_v57 }
 0x13d   : > { %v1302_v12 = vmul.f32 %v1237_v59, %v1179_v56  ;;  %v1303_v19 = vmul.f32 %v1241_v63, %v1180_v0  ;;  %1826 = vrot.lane.b32.xlu1 %v3494_v14, %s3180_s11  ;;  %v2013_v63 = vld [vmem:[#allocation2 + $0xb0] sm:$0xff] }
 0x13e   : > { %1824 = vrot.lane.b32.xlu0 %v3445_v13, %s3180_s11  ;;  %v2056_v17 = vld [vmem:[#allocation2 + $0x208] sm:$0xf]  ;;  %v1661_v13 = vrot.slane %v3714_v45, %v3768_v18  ;;  %v2057_v8 = vld [vmem:[#allocation2 + $0x210] sm:$0xf] }
 0x13f   : > { %v1334_v9 = vrot.slane %v1302_v12, 4  ;;  %v1335_v50 = vrot.slane %v1303_v19, 4  ;;  %v3945_v10 = vpop.permute.xlu1 %1158  ;;  %v1157_v28 = vpop.permute.xlu0 %1156  ;;  %2837 = vmatprep.subr.msk.mxu0 %vm2081_vm8, %v2056_v17  ;;  %v2892_v12 = vpack.c.bf16 %v2014_v44, %v1998_v60  ;;  %v1997_v17 = vld [vmem:[#allocation2 + $0x30] sm:$0xff] }
 0x140   : > { %v1181_v36 = vsel %vm1174_vm4, %v1155_v61, %v1157_v28  ;;  %v1182_v14 = vsel %vm1174_vm4, %v1157_v28, %v3945_v10  ;;  %v1669_v61 = vrot.slane %v3714_v45, %v3795_v40  ;;  %v530_v44 = vld [vmem:[#allocation6 + $0x41] ss:$8 sm:$0xf0] }
 0x141   : > { %1366 = vst [vmem:[#allocation2 + $0x120] sm:$0xf0] %v1334_v9  ;;  %1367 = vst [vmem:[#allocation2 + $0x128] sm:$0xf0] %v1335_v50  ;;  %v1304_v1 = vmul.f32 %v1245_v26, %v1181_v36  ;;  %v1305_v38 = vmul.f32 %v1249_v11, %v1182_v14  ;;  %1170 = vrot.lane.b32.xlu1 %v3381_v2, %s3177_s14  ;;  %v1995_v26 = vld [vmem:[#allocation2 + $0x20] sm:$0xff] }
 0x142   : > { %1168 = vrot.lane.b32.xlu0 %v3515_v15, %s3177_s14  ;;  %v2058_v46 = vld [vmem:[#allocation2 + $0x218] sm:$0xf]  ;;  %v2055_v22 = vld [vmem:[#allocation2 + $0x200] sm:$0xf]  ;;  %v2886_v45 = vpack.c.bf16 %v2011_v48, %v1995_v26 }
 0x143   : > { %v1336_v51 = vrot.slane %v1304_v1, 4  ;;  %v1337_v58 = vrot.slane %v1305_v38, 4  ;;  %v1579_v7 = vpop.permute.xlu1 %1578  ;;  %2840 = vmatprep.subr.msk.mxu1 %vm2081_vm8, %v2058_v46  ;;  %v1577_v59 = vpop.permute.xlu0 %1576  ;;  %2838 = vmatpush1.msk.msra.mxu0 %vm2081_vm8, %v2055_v22 }
 0x144   : > { %v1603_v56 = vsel %vm1598_vm5, %v3736_v37, %v1577_v59  ;;  %v1604_v0 = vsel %vm1598_vm5, %v1577_v59, %v1579_v7  ;;  %2841 = vmatpush1.msk.msra.mxu1 %vm2081_vm8, %v2057_v8  ;;  %2885 = vmatprep.subr.bf16.mxu0 %v2884_v47  ;;  %v2894_v37 = vpack.c.bf16 %v2013_v63, %v1997_v17 }
 0x145   : > { %1368 = vst [vmem:[#allocation2 + $0x130] sm:$0xf0] %v1336_v51  ;;  %1369 = vst [vmem:[#allocation2 + $0x138] sm:$0xf0] %v1337_v58  ;;  %v1726_v19 = vmul.f32 %v1661_v13, %v1603_v56  ;;  %v1727_v11 = vmul.f32 %v1665_v29, %v1604_v0  ;;  %1592 = vrot.lane.b32.xlu1 %v3515_v15, %s3178_s21  ;;  %2839 = vmatmul.mubr.msk.f32.vlgmr.msra.gmra.mrb[0].mxu0 %vm2077_vm9, %v3962_v41 }
 0x146   : > { %1172 = vrot.lane.b32.xlu0 %v3399_v5, %s3177_s14  ;;  %2893 = vmatprep.subr.bf16.mxu1 %v2892_v12  ;;  %v1473_v13 = vrot.slane %v3749_v49, %v3768_v18  ;;  %v1477_v29 = vrot.slane %v3749_v49, %v3786_v33  ;;  %v4002_v59 = vor.u32 %v530_v44, %v529_v39 }
 0x147   : > { %v1758_v9 = vrot.slane %v1726_v19, 4  ;;  %v1759_v50 = vrot.slane %v1727_v11, 4  ;;  %2887 = vmatpush1.bf16.msra.mxu0 %v2886_v45  ;;  %2842 = vmatmul.mubr.msk.f32.vlgmr.msra.gmra.mrb[0].mxu1 %vm2077_vm9, %v3962_v41  ;;  %v3982_v28 = vpop.permute.xlu1 %1582  ;;  %v953_v19 = vld [vmem:[#allocation6 + $0x43] ss:$8 sm:$0xf] }
 0x148   : > { %v1581_v34 = vpop.permute.xlu0 %1580  ;;  %2895 = vmatpush1.bf16.msra.mxu1 %v2894_v37  ;;  %2336 = vmatprep.mubr.f32.mxu0 %v3181_v20  ;;  %v569_v0 = vrot.slane %v4002_v59, %v3602_v42  ;;  %v954_v11 = vld [vmem:[#allocation6 + $0x43] ss:$8 sm:$0xf0] }
 0x149   : > { %v1605_v36 = vsel %vm1598_vm5, %v1579_v7, %v1581_v34  ;;  %v1606_v14 = vsel %vm1598_vm5, %v1581_v34, %v3982_v28  ;;  %1790 = vst [vmem:[#allocation2 + $0x1a0] sm:$0xf0] %v1758_v9  ;;  %1791 = vst [vmem:[#allocation2 + $0x1a8] sm:$0xf0] %v1759_v50  ;;  %1596 = vrot.lane.b32.xlu1 %v3399_v5, %s3178_s21  ;;  %2407 = vmatprep.mubr.f32.mxu1 %v3181_v20 }
 0x14a   : > { %v1728_v1 = vmul.f32 %v1669_v61, %v1605_v36  ;;  %v1729_v38 = vmul.f32 %v1673_v62, %v1606_v14  ;;  %1594 = vrot.lane.b32.xlu0 %v3381_v2, %s3178_s21  ;;  %v1481_v7 = vrot.slane %v3749_v49, %v3795_v40  ;;  %v4028_v50 = vor.u32 %v954_v11, %v953_v19  ;;  %s4351_s21 = scalar_lea.hbm %s4406_s4, %s2867_s23 }
 0x14b   : > { %v1391_v47 = vpop.permute.xlu1 %1390  ;;  %v581_v14 = vrot.slane %v4002_v59, %v3567_v21 }
 0x14c   : > { %v1760_v46 = vrot.slane %v1728_v1, 4  ;;  %v1761_v22 = vrot.slane %v1729_v38, 4  ;;  %v1389_v48 = vpop.permute.xlu0 %1388  ;;  %v2027_v1 = vld [vmem:[#allocation2 + $0x120] sm:$0xff] }
 0x14d   : > { %v1415_v51 = vsel %vm1410_vm6, %v3778_v23, %v1389_v48  ;;  %v1416_v58 = vsel %vm1410_vm6, %v1389_v48, %v1391_v47  ;;  %1406 = vrot.lane.b32.xlu1 %v3381_v2, %s3179_s6  ;;  %v1485_v23 = vrot.slane %v3749_v49, %v3812_v57  ;;  %v573_v49 = vrot.slane %v4002_v59, %v3572_v27 }
 0x14e   : > { %1792 = vst [vmem:[#allocation2 + $0x1b0] sm:$0xf0] %v1760_v46  ;;  %1793 = vst [vmem:[#allocation2 + $0x1b8] sm:$0xf0] %v1761_v22  ;;  %v1538_v8 = vmul.f32 %v1473_v13, %v1415_v51  ;;  %v1539_v60 = vmul.f32 %v1477_v29, %v1416_v58  ;;  %1404 = vrot.lane.b32.xlu0 %v3515_v15, %s3179_s6  ;;  %v2028_v13 = vld [vmem:[#allocation2 + $0x128] sm:$0xff]  ;;  %v993_v51 = vrot.slane %v4028_v50, %v3602_v42 }
 0x14f   : > { %v4010_v63 = vpop.permute.xlu1 %1394  ;;  %v341_v58 = vld [vmem:[#allocation6 + $0x40] ss:$8 sm:$0xf] }
 0x150   : > { %1554 = vst [vmem:[#allocation2 + $0x1a0] sm:$0xf] %v1538_v8  ;;  %1555 = vst [vmem:[#allocation2 + $0x1a8] sm:$0xf] %v1539_v60  ;;  %v1393_v61 = vpop.permute.xlu0 %1392  ;;  %v997_v60 = vrot.slane %v4028_v50, %v3572_v27 }
 0x151   : > { %v1417_v62 = vsel %vm1410_vm6, %v1391_v47, %v1393_v61  ;;  %v1418_v56 = vsel %vm1410_vm6, %v1393_v61, %v4010_v63  ;;  %1828 = vrot.lane.b32.xlu1 %v3515_v15, %s3180_s11  ;;  %v577_v15 = vrot.slane %v4002_v59, %v3583_v30  ;;  %v342_v61 = vld [vmem:[#allocation6 + $0x40] ss:$8 sm:$0xf0] }
 0x152   : > { %v1540_v26 = vmul.f32 %v1481_v7, %v1417_v62  ;;  %v1541_v12 = vmul.f32 %v1485_v23, %v1418_v56  ;;  %1408 = vrot.lane.b32.xlu0 %v3399_v5, %s3179_s6  ;;  %v2030_v23 = vld [vmem:[#allocation2 + $0x138] sm:$0xff]  ;;  %v3182_v62 = vmov 0   ;;  %s3083_s6 = scalar_lea.vmem %s4353_s27, 2048 }
 0x153   : > { %v480_v45 = vpop.permute.xlu1 %479  ;;  %3015 = vset.pattern.permute.xlu0 %v3182_v62  ;;  %p3084_p2 = scmp.ne.s32.totalorder %s4353_s27, %s3083_s6 }
 0x154   : > { %1556 = vst [vmem:[#allocation2 + $0x1b0] sm:$0xf] %v1540_v26  ;;  %1557 = vst [vmem:[#allocation2 + $0x1b8] sm:$0xf] %v1541_v12  ;;  %v478_v17 = vpop.permute.xlu0 %477 }
 0x155   : > { %v499_v37 = vsel %vm491_vm0, %v3824_v35, %v478_v17  ;;  %v500_v9 = vsel %vm491_vm0, %v478_v17, %v480_v45  ;;  %1832 = vrot.lane.b32.xlu1 %v3399_v5, %s3180_s11  ;;  %v2071_v5 = vld [vmem:[%s4404_s2] sm:$0xff]  ;;  %p3085_p6 = pnand %p3084_p2, %p3310_p13 }
 0x156   : > { %v622_v34 = vmul.f32 %v569_v0, %v499_v37  ;;  %v623_v36 = vmul.f32 %v573_v49, %v500_v9  ;;  %1830 = vrot.lane.b32.xlu0 %v3381_v2, %s3180_s11  ;;  %v2029_v0 = vld [vmem:[#allocation2 + $0x130] sm:$0xff]  ;;  %s3183_s11 = smov [#allocation8]  }
 0x157   : > { %v2044_v35 = vld [vmem:[#allocation2 + $0x1a8] sm:$0xff]  ;;  %v2043_v38 = vld [vmem:[#allocation2 + $0x1a0] sm:$0xff]  ;;  %v4036_v44 = vpop.permute.xlu1 %483  ;;  %p3086_p8 = pneg %p3085_p6  ;;  %s3087_s9 = sshll.u32 %s3183_s11, 4  ;;  %s3088_s9 = int_to_ptr.vmem [resolvable:$false] %s3087_s9 }
 0x158   : > { %v654_v29 = vrot.slane %v622_v34, 4  ;;  %v655_v39 = vrot.slane %v623_v36, 4  ;;  %v482_v46 = vpop.permute.xlu0 %481  ;;  %v2888_v22 = vpack.c.bf16 %v2044_v35, %v2028_v13  ;;  %v2890_v47 = vpack.c.bf16 %v2043_v38, %v2027_v1  ;;  %s3089_s12 = scalar_lea.vmem %s3088_s9, 4096  ;;  %p3090_p9 = scmp.lt.s32.totalorder %s4353_s27, %s3088_s9 }
 0x159   : > { %v501_v2 = vsel %vm491_vm0, %v480_v45, %v482_v46  ;;  %v502_v48 = vsel %vm491_vm0, %v482_v46, %v4036_v44  ;;  %v4055_v13 = vor.u32 %v342_v61, %v341_v58  ;;  %p3091_p12 = scmp.lt.s32.totalorder %s3089_s12, %s3083_s6 }
 0x15a   : > { %686 = vst [vmem:[#allocation2 + $0x40] sm:$0xf0] %v654_v29  ;;  %687 = vst [vmem:[#allocation2 + $0x48] sm:$0xf0] %v655_v39  ;;  %v624_v7 = vmul.f32 %v577_v15, %v501_v2  ;;  %v625_v8 = vmul.f32 %v581_v14, %v502_v48  ;;  %2889 = vmatprep.subr.bf16.mxu0 %v2888_v22  ;;  %2074 = vperm.xlu0 %3015, %v2071_v5  }
 0x15b   : > { %2891 = vmatpush1.bf16.msra.mxu0 %v2890_v47  ;;  %v2046_v56 = vld [vmem:[#allocation2 + $0x1b8] sm:$0xff]  ;;  %v2045_v26 = vld [vmem:[#allocation2 + $0x1b0] sm:$0xff]  ;;  %v904_v19 = vpop.permute.xlu1 %903  ;;  %v1001_v15 = vrot.slane %v4028_v50, %v3583_v30  ;;  %v1005_v14 = vrot.slane %v4028_v50, %v3567_v21  ;;  %v381_v47 = vrot.slane %v4055_v13, %v3602_v42  ;;  %v385_v5 = vrot.slane %v4055_v13, %v3572_v27  ;;  %p3092_p0 = por %p3091_p12, %p3090_p9 }
 0x15c   : > { %v656_v12 = vrot.slane %v624_v7, 4  ;;  %v657_v49 = vrot.slane %v625_v8, 4  ;;  %v902_v11 = vpop.permute.xlu0 %901  ;;  %v2896_v45 = vpack.c.bf16 %v2046_v56, %v2030_v23  ;;  %v2898_v17 = vpack.c.bf16 %v2045_v26, %v2029_v0  ;;  %v765_v2 = vld [vmem:[#allocation6 + $0x42] ss:$8 sm:$0xf] }
 0x15d   : > { %v923_v37 = vsel %vm915_vm1, %v3848_v24, %v902_v11  ;;  %v924_v9 = vsel %vm915_vm1, %v902_v11, %v904_v19  ;;  %v766_v48 = vld [vmem:[#allocation6 + $0x42] ss:$8 sm:$0xf0]  ;;  %v389_v61 = vrot.slane %v4055_v13, %v3583_v30  ;;  %v393_v0 = vrot.slane %v4055_v13, %v3567_v21  ;;  %p3093_p5 = pnand %p3092_p0, %p3086_p8 }
 0x15e   : > { %688 = vst [vmem:[#allocation2 + $0x50] sm:$0xf0] %v656_v12  ;;  %689 = vst [vmem:[#allocation2 + $0x58] sm:$0xf0] %v657_v49  ;;  %v1046_v34 = vmul.f32 %v993_v51, %v923_v37  ;;  %v1047_v36 = vmul.f32 %v997_v60, %v924_v9  ;;  %2897 = vmatprep.subr.bf16.mxu1 %v2896_v45  ;;  %v4073_v26 = vor.u32 %v766_v48, %v765_v2 }
 0x15f   : > { %2899 = vmatpush1.bf16.msra.mxu1 %v2898_v17  ;;  %v4057_v38 = vpop.permute.xlu1 %907  ;;  %v1901_v2 = vrot.slane %v3894_v25, %v3786_v33  ;;  %v1213_v48 = vld [vmem:[#allocation6 + $0x44] ss:$8 sm:$0xf] }
 0x160   : > { %v1078_v35 = vrot.slane %v1046_v34, 4  ;;  %v1079_v1 = vrot.slane %v1047_v36, 4  ;;  %v906_v24 = vpop.permute.xlu0 %905  ;;  %v805_v17 = vrot.slane %v4073_v26, %v3602_v42  ;;  %v809_v37 = vrot.slane %v4073_v26, %v3572_v27 }
 0x161   : > { %v925_v29 = vsel %vm915_vm1, %v904_v19, %v906_v24  ;;  %v926_v39 = vsel %vm915_vm1, %v906_v24, %v4057_v38  ;;  %v817_v24 = vrot.slane %v4073_v26, %v3567_v21 }
 0x162   : > { %1110 = vst [vmem:[#allocation2 + $0xc0] sm:$0xf0] %v1078_v35  ;;  %1111 = vst [vmem:[#allocation2 + $0xc8] sm:$0xf0] %v1079_v1  ;;  %v1048_v46 = vmul.f32 %v1001_v15, %v925_v29  ;;  %v1049_v22 = vmul.f32 %v1005_v14, %v926_v39  ;;  %v813_v1 = vrot.slane %v4073_v26, %v3583_v30 }
 0x163   : > { %v293_v7 = vpop.permute.xlu1 %292 }
 0x164   : > { %v1080_v51 = vrot.slane %v1048_v46, 4  ;;  %v1081_v58 = vrot.slane %v1049_v22, 4  ;;  %v291_v8 = vpop.permute.xlu0 %290 }
 0x165   : > { %v312_v60 = vsel %vm304_vm2, %v3872_v31, %v291_v8  ;;  %v313_v23 = vsel %vm304_vm2, %v291_v8, %v293_v7 }
 0x166   : > { %1112 = vst [vmem:[#allocation2 + $0xd0] sm:$0xf0] %v1080_v51  ;;  %1113 = vst [vmem:[#allocation2 + $0xd8] sm:$0xf0] %v1081_v58  ;;  %v434_v62 = vmul.f32 %v381_v47, %v312_v60  ;;  %v435_v56 = vmul.f32 %v385_v5, %v313_v23  ;;  %v1897_v5 = vrot.slane %v3894_v25, %v3768_v18 }
 0x167   : > { %v4075_v12 = vpop.permute.xlu1 %296  ;;  %v1214_v51 = vld [vmem:[#allocation6 + $0x44] ss:$8 sm:$0xf0]  ;;  %v1905_v23 = vrot.slane %v3894_v25, %v3795_v40 }
 0x168   : > { %450 = vst [vmem:[#allocation2 + $0x40] sm:$0xf] %v434_v62  ;;  %451 = vst [vmem:[#allocation2 + $0x48] sm:$0xf] %v435_v56  ;;  %v295_v49 = vpop.permute.xlu0 %294  ;;  %v1909_v56 = vrot.slane %v3894_v25, %v3812_v57 }
 0x169   : > { %v314_v31 = vsel %vm304_vm2, %v293_v7, %v295_v49  ;;  %v315_v19 = vsel %vm304_vm2, %v295_v49, %v4075_v12 }
 0x16a   : > { %v436_v11 = vmul.f32 %v389_v61, %v314_v31  ;;  %v437_v45 = vmul.f32 %v393_v0, %v315_v19  ;;  %v4107_v0 = vor.u32 %v1214_v51, %v1213_v48 }
 0x16b   : > { %v716_v9 = vpop.permute.xlu1 %715 }
 0x16c   : > { %452 = vst [vmem:[#allocation2 + $0x50] sm:$0xf] %v436_v11  ;;  %453 = vst [vmem:[#allocation2 + $0x58] sm:$0xf] %v437_v45  ;;  %v714_v15 = vpop.permute.xlu0 %713  ;;  %v1257_v25 = vrot.slane %v4107_v0, %v3572_v27 }
 0x16d   : > { %v735_v34 = vsel %vm727_vm3, %v3896_v32, %v714_v15  ;;  %v736_v36 = vsel %vm727_vm3, %v714_v15, %v716_v9 }
 0x16e   : > { %v858_v14 = vmul.f32 %v805_v17, %v735_v34  ;;  %v859_v35 = vmul.f32 %v809_v37, %v736_v36  ;;  %v1253_v17 = vrot.slane %v4107_v0, %v3602_v42  ;;  %v1637_v37 = vld [vmem:[#allocation6 + $0x46] ss:$8 sm:$0xf] }
 0x16f   : > { %v4091_v29 = vpop.permute.xlu1 %719 }
 0x170   : > { %874 = vst [vmem:[#allocation2 + $0xc0] sm:$0xf] %v858_v14  ;;  %875 = vst [vmem:[#allocation2 + $0xc8] sm:$0xf] %v859_v35  ;;  %v718_v39 = vpop.permute.xlu0 %717 }
 0x171   : > { %v737_v46 = vsel %vm727_vm3, %v716_v9, %v718_v39  ;;  %v738_v32 = vsel %vm727_vm3, %v718_v39, %v4091_v29  ;;  %v1638_v9 = vld [vmem:[#allocation6 + $0x46] ss:$8 sm:$0xf0] }
 0x172   : > { %v860_v22 = vmul.f32 %v813_v1, %v737_v46  ;;  %v861_v47 = vmul.f32 %v817_v24, %v738_v32  ;;  %v4121_v1 = vor.u32 %v1638_v9, %v1637_v37  ;;  %v1261_v46 = vrot.slane %v4107_v0, %v3583_v30 }
 0x173   : > { %v1815_v58 = vpop.permute.xlu1 %1814  ;;  %v1265_v32 = vrot.slane %v4107_v0, %v3567_v21  ;;  %v2002_v9 = vld [vmem:[#allocation2 + $0x58] sm:$0xff] }
 0x174   : > { %876 = vst [vmem:[#allocation2 + $0xd0] sm:$0xf] %v860_v22  ;;  %877 = vst [vmem:[#allocation2 + $0xd8] sm:$0xf] %v861_v47  ;;  %v1813_v7 = vpop.permute.xlu0 %1812 }
 0x175   : > { %v1839_v8 = vsel %vm1834_vm7, %v3920_v52, %v1813_v7  ;;  %v1840_v60 = vsel %vm1834_vm7, %v1813_v7, %v1815_v58 }
 0x176   : > { %v1962_v61 = vmul.f32 %v1897_v5, %v1839_v8  ;;  %v1963_v62 = vmul.f32 %v1901_v2, %v1840_v60  ;;  %v2000_v2 = vld [vmem:[#allocation2 + $0x48] sm:$0xff]  ;;  %v1999_v8 = vld [vmem:[#allocation2 + $0x40] sm:$0xff] }
 0x177   : > { %v4109_v49 = vpop.permute.xlu1 %1818  ;;  %v2016_v35 = vld [vmem:[#allocation2 + $0xc8] sm:$0xff]  ;;  %v2015_v22 = vld [vmem:[#allocation2 + $0xc0] sm:$0xff] }
 0x178   : > { %1978 = vst [vmem:[#allocation2 + $0x220] sm:$0xf] %v1962_v61  ;;  %1979 = vst [vmem:[#allocation2 + $0x228] sm:$0xf] %v1963_v62  ;;  %v1817_v31 = vpop.permute.xlu0 %1816  ;;  %v2900_v7 = vpack.c.bf16 %v2016_v35, %v2000_v2  ;;  %v2902_v61 = vpack.c.bf16 %v2015_v22, %v1999_v8  ;;  %v1677_v62 = vrot.slane %v4121_v1, %v3602_v42 }
 0x179   : > { %v1841_v19 = vsel %vm1834_vm7, %v1815_v58, %v1817_v31  ;;  %v1842_v52 = vsel %vm1834_vm7, %v1817_v31, %v4109_v49  ;;  %v1449_v31 = vld [vmem:[#allocation6 + $0x45] ss:$8 sm:$0xf] }
 0x17a   : > { %v1964_v11 = vmul.f32 %v1905_v23, %v1841_v19  ;;  %v1965_v45 = vmul.f32 %v1909_v56, %v1842_v52 }
 0x17b   : > { %v1163_v15 = vpop.permute.xlu1 %1162  ;;  %v2018_v56 = vld [vmem:[#allocation2 + $0xd8] sm:$0xff] }
 0x17c   : > { %1980 = vst [vmem:[#allocation2 + $0x230] sm:$0xf] %v1964_v11  ;;  %1981 = vst [vmem:[#allocation2 + $0x238] sm:$0xf] %v1965_v45  ;;  %v1161_v34 = vpop.permute.xlu0 %1160  ;;  %v1681_v11 = vrot.slane %v4121_v1, %v3572_v27  ;;  %v2017_v45 = vld [vmem:[#allocation2 + $0xd0] sm:$0xff]  ;;  %v2908_v35 = vpack.c.bf16 %v2018_v56, %v2002_v9 }
 0x17d   : > { %v1183_v36 = vsel %vm1174_vm4, %v3945_v10, %v1161_v34  ;;  %v1184_v14 = vsel %vm1174_vm4, %v1161_v34, %v1163_v15 }
 0x17e   : > { %v1306_v24 = vmul.f32 %v1253_v17, %v1183_v36  ;;  %v1307_v39 = vmul.f32 %v1257_v25, %v1184_v14  ;;  %v1450_v17 = vld [vmem:[#allocation6 + $0x45] ss:$8 sm:$0xf0] }
 0x17f   : > { %v2060_v47 = vld [vmem:[#allocation2 + $0x228] sm:$0xf]  ;;  %v2059_v5 = vld [vmem:[#allocation2 + $0x220] sm:$0xf]  ;;  %v4127_v10 = vpop.permute.xlu1 %1166 }
 0x180   : > { %v1338_v48 = vrot.slane %v1306_v24, 4  ;;  %v1339_v51 = vrot.slane %v1307_v39, 4  ;;  %v1165_v58 = vpop.permute.xlu0 %1164  ;;  %2843 = vmatprep.subr.msk.mxu0 %vm2081_vm8, %v2060_v47  ;;  %v2001_v24 = vld [vmem:[#allocation2 + $0x50] sm:$0xff]  ;;  %v1685_v39 = vrot.slane %v4121_v1, %v3583_v30  ;;  %v1689_v47 = vrot.slane %v4121_v1, %v3567_v21 }
 0x181   : > { %v1185_v60 = vsel %vm1174_vm4, %v1163_v15, %v1165_v58  ;;  %v1186_v23 = vsel %vm1174_vm4, %v1165_v58, %v4127_v10  ;;  %2844 = vmatpush1.msk.msra.mxu0 %vm2081_vm8, %v2059_v5  ;;  %v2910_v22 = vpack.c.bf16 %v2017_v45, %v2001_v24 }
 0x182   : > { %1370 = vst [vmem:[#allocation2 + $0x140] sm:$0xf0] %v1338_v48  ;;  %1371 = vst [vmem:[#allocation2 + $0x148] sm:$0xf0] %v1339_v51  ;;  %v1308_v19 = vmul.f32 %v1261_v46, %v1185_v60  ;;  %v1309_v52 = vmul.f32 %v1265_v32, %v1186_v23  ;;  %2901 = vmatprep.subr.bf16.mxu0 %v2900_v7  ;;  %2845 = vmatmul.mubr.msk.f32.vlgmr.msra.gmra.mrb[2].mxu0 %vm2077_vm9, %v3962_v41 }
 0x183   : > { %2903 = vmatpush1.bf16.msra.mxu0 %v2902_v61  ;;  %v2062_v25 = vld [vmem:[#allocation2 + $0x238] sm:$0xf]  ;;  %v2061_v37 = vld [vmem:[#allocation2 + $0x230] sm:$0xf]  ;;  %2478 = vmatprep.mubr.f32.mxu0 %v3181_v20  ;;  %v1587_v36 = vpop.permute.xlu1 %1586  ;;  %v4152_v48 = vor.u32 %v1450_v17, %v1449_v31 }
 0x184   : > { %v1340_v15 = vrot.slane %v1308_v19, 4  ;;  %v1341_v34 = vrot.slane %v1309_v52, 4  ;;  %2846 = vmatprep.subr.msk.mxu1 %vm2081_vm8, %v2062_v25  ;;  %v1585_v14 = vpop.permute.xlu0 %1584 }
 0x185   : > { %v1607_v46 = vsel %vm1598_vm5, %v3982_v28, %v1585_v14  ;;  %v1608_v32 = vsel %vm1598_vm5, %v1585_v14, %v1587_v36  ;;  %2847 = vmatpush1.msk.msra.mxu1 %vm2081_vm8, %v2061_v37  ;;  %v1493_v56 = vrot.slane %v4152_v48, %v3572_v27  ;;  %v1497_v9 = vrot.slane %v4152_v48, %v3583_v30 }
 0x186   : > { %1372 = vst [vmem:[#allocation2 + $0x150] sm:$0xf0] %v1340_v15  ;;  %1373 = vst [vmem:[#allocation2 + $0x158] sm:$0xf0] %v1341_v34  ;;  %v1730_v5 = vmul.f32 %v1677_v62, %v1607_v46  ;;  %v1731_v2 = vmul.f32 %v1681_v11, %v1608_v32  ;;  %2909 = vmatprep.subr.bf16.mxu1 %v2908_v35  ;;  %2848 = vmatmul.mubr.msk.f32.vlgmr.msra.gmra.mrb[2].mxu1 %vm2077_vm9, %v3962_v41 }
 0x187   : > { %2911 = vmatpush1.bf16.msra.mxu1 %v2910_v22  ;;  %2549 = vmatprep.mubr.f32.mxu1 %v3181_v20  ;;  %v4155_v58 = vpop.permute.xlu1 %1590  ;;  %v1489_v62 = vrot.slane %v4152_v48, %v3602_v42  ;;  %v1501_v15 = vrot.slane %v4152_v48, %v3567_v21  ;;  %v589_v46 = vrot.slane %v4002_v59, %v3786_v33 }
 0x188   : > { %v1762_v28 = vrot.slane %v1730_v5, 4  ;;  %v1763_v51 = vrot.slane %v1731_v2, 4  ;;  %v1589_v7 = vpop.permute.xlu0 %1588  ;;  %v1009_v2 = vrot.slane %v4028_v50, %v3768_v18 }
 0x189   : > { %v1609_v8 = vsel %vm1598_vm5, %v1587_v36, %v1589_v7  ;;  %v1610_v60 = vsel %vm1598_vm5, %v1589_v7, %v4155_v58  ;;  %v593_v7 = vrot.slane %v4002_v59, %v3795_v40 }
 0x18a   : > { %1794 = vst [vmem:[#allocation2 + $0x1c0] sm:$0xf0] %v1762_v28  ;;  %1795 = vst [vmem:[#allocation2 + $0x1c8] sm:$0xf0] %v1763_v51  ;;  %v1732_v23 = vmul.f32 %v1685_v39, %v1609_v8  ;;  %v1733_v61 = vmul.f32 %v1689_v47, %v1610_v60  ;;  %v585_v39 = vrot.slane %v4002_v59, %v3768_v18  ;;  %v2032_v60 = vld [vmem:[#allocation2 + $0x148] sm:$0xff] }
 0x18b   : > { %v1399_v52 = vpop.permute.xlu1 %1398  ;;  %v597_v8 = vrot.slane %v4002_v59, %v3812_v57 }
 0x18c   : > { %v1764_v31 = vrot.slane %v1732_v23, 4  ;;  %v1765_v19 = vrot.slane %v1733_v61, 4  ;;  %v1397_v11 = vpop.permute.xlu0 %1396  ;;  %v2031_v61 = vld [vmem:[#allocation2 + $0x140] sm:$0xff] }
 0x18d   : > { %v1419_v45 = vsel %vm1410_vm6, %v4010_v63, %v1397_v11  ;;  %v1420_v17 = vsel %vm1410_vm6, %v1397_v11, %v1399_v52 }
 0x18e   : > { %1796 = vst [vmem:[#allocation2 + $0x1d0] sm:$0xf0] %v1764_v31  ;;  %1797 = vst [vmem:[#allocation2 + $0x1d8] sm:$0xf0] %v1765_v19  ;;  %v1542_v25 = vmul.f32 %v1489_v62, %v1419_v45  ;;  %v1543_v37 = vmul.f32 %v1493_v56, %v1420_v17 }
 0x18f   : > { %v4171_v34 = vpop.permute.xlu1 %1402 }
 0x190   : > { %1558 = vst [vmem:[#allocation2 + $0x1c0] sm:$0xf] %v1542_v25  ;;  %1559 = vst [vmem:[#allocation2 + $0x1c8] sm:$0xf] %v1543_v37  ;;  %v1401_v36 = vpop.permute.xlu0 %1400  ;;  %v1013_v37 = vrot.slane %v4028_v50, %v3786_v33 }
 0x191   : > { %v1421_v14 = vsel %vm1410_vm6, %v1399_v52, %v1401_v36  ;;  %v1422_v63 = vsel %vm1410_vm6, %v1401_v36, %v4171_v34 }
 0x192   : > { %v1544_v35 = vmul.f32 %v1497_v9, %v1421_v14  ;;  %v1545_v24 = vmul.f32 %v1501_v15, %v1422_v63  ;;  %v1017_v14 = vrot.slane %v4028_v50, %v3795_v40  ;;  %v2034_v63 = vld [vmem:[#allocation2 + $0x158] sm:$0xff] }
 0x193   : > { %v488_v32 = vpop.permute.xlu1 %487 }
 0x194   : > { %1560 = vst [vmem:[#allocation2 + $0x1d0] sm:$0xf] %v1544_v35  ;;  %1561 = vst [vmem:[#allocation2 + $0x1d8] sm:$0xf] %v1545_v24  ;;  %v486_v22 = vpop.permute.xlu0 %485  ;;  %v397_v24 = vrot.slane %v4055_v13, %v3768_v18 }
 0x195   : > { %v503_v47 = vsel %vm491_vm0, %v4036_v44, %v486_v22  ;;  %v504_v5 = vsel %vm491_vm0, %v486_v22, %v488_v32  ;;  %v1021_v44 = vrot.slane %v4028_v50, %v3812_v57 }
 0x196   : > { %v626_v28 = vmul.f32 %v585_v39, %v503_v47  ;;  %v627_v51 = vmul.f32 %v589_v46, %v504_v5  ;;  %v2033_v5 = vld [vmem:[#allocation2 + $0x150] sm:$0xff] }
 0x197   : > { %v2048_v23 = vld [vmem:[#allocation2 + $0x1c8] sm:$0xff]  ;;  %v2047_v62 = vld [vmem:[#allocation2 + $0x1c0] sm:$0xff]  ;;  %v910_v19 = vpop.permute.xlu1 %909 }
 0x198   : > { %v658_v56 = vrot.slane %v626_v28, 4  ;;  %v659_v31 = vrot.slane %v627_v51, 4  ;;  %v490_v52 = vpop.permute.xlu0 %489  ;;  %v2904_v11 = vpack.c.bf16 %v2048_v23, %v2032_v60  ;;  %v2906_v45 = vpack.c.bf16 %v2047_v62, %v2031_v61 }
 0x199   : > { %v927_v17 = vsel %vm915_vm1, %v4057_v38, %v910_v19  ;;  %v505_v25 = vsel %vm491_vm0, %v488_v32, %v490_v52  ;;  %v506_v59 = vsel %vm491_vm0, %v490_v52, %v3630_v4  ;;  %v401_v23 = vrot.slane %v4055_v13, %v3786_v33 }
 0x19a   : > { %690 = vst [vmem:[#allocation2 + $0x60] sm:$0xf0] %v658_v56  ;;  %691 = vst [vmem:[#allocation2 + $0x68] sm:$0xf0] %v659_v31  ;;  %v1050_v9 = vmul.f32 %v1009_v2, %v927_v17  ;;  %v628_v15 = vmul.f32 %v593_v7, %v505_v25  ;;  %v629_v36 = vmul.f32 %v597_v8, %v506_v59  ;;  %2905 = vmatprep.subr.bf16.mxu0 %v2904_v11 }
 0x19b   : > { %2907 = vmatpush1.bf16.msra.mxu0 %v2906_v45  ;;  %v2050_v38 = vld [vmem:[#allocation2 + $0x1d8] sm:$0xff]  ;;  %v2049_v35 = vld [vmem:[#allocation2 + $0x1d0] sm:$0xff]  ;;  %v914_v32 = vpop.permute.xlu1 %913  ;;  %v405_v17 = vrot.slane %v4055_v13, %v3795_v40  ;;  %v409_v25 = vrot.slane %v4055_v13, %v3812_v57 }
 0x19c   : > { %v1082_v4 = vrot.slane %v1050_v9, 4  ;;  %v660_v39 = vrot.slane %v628_v15, 4  ;;  %v661_v46 = vrot.slane %v629_v36, 4  ;;  %v912_v22 = vpop.permute.xlu0 %911  ;;  %v2912_v47 = vpack.c.bf16 %v2050_v38, %v2034_v63  ;;  %v1873_v59 = vld [vmem:[#allocation6 + $0x47] ss:$8 sm:$0xf] }
 0x19d   : > { %v930_v2 = vsel %vm915_vm1, %v914_v32, %v3628_v3  ;;  %v928_v28 = vsel %vm915_vm1, %v910_v19, %v912_v22  ;;  %v929_v50 = vsel %vm915_vm1, %v912_v22, %v914_v32  ;;  %v2914_v51 = vpack.c.bf16 %v2049_v35, %v2033_v5 }
 0x19e   : > { %1114 = vst [vmem:[#allocation2 + $0xe0] sm:$0xf0] %v1082_v4  ;;  %692 = vst [vmem:[#allocation2 + $0x70] sm:$0xf0] %v660_v39  ;;  %v1053_v7 = vmul.f32 %v1021_v44, %v930_v2  ;;  %v1051_v8 = vmul.f32 %v1013_v37, %v928_v28  ;;  %v1052_v60 = vmul.f32 %v1017_v14, %v929_v50  ;;  %2913 = vmatprep.subr.bf16.mxu1 %v2912_v47 }
 0x19f   : > { %693 = vst [vmem:[#allocation2 + $0x78] sm:$0xf0] %v661_v46  ;;  %2915 = vmatpush1.bf16.msra.mxu1 %v2914_v51  ;;  %v301_v3 = vpop.permute.xlu1 %300  ;;  %v821_v44 = vrot.slane %v4073_v26, %v3768_v18  ;;  %v1874_v37 = vld [vmem:[#allocation6 + $0x47] ss:$8 sm:$0xf0]  ;;  %v833_v15 = vrot.slane %v4073_v26, %v3812_v57  ;;  %v825_v36 = vrot.slane %v4073_v26, %v3786_v33 }
 0x1a0   : > { %v1085_v61 = vrot.slane %v1053_v7, 4  ;;  %v1083_v62 = vrot.slane %v1051_v8, 4  ;;  %v1084_v56 = vrot.slane %v1052_v60, 4  ;;  %v299_v31 = vpop.permute.xlu0 %298  ;;  %v4226_v38 = vor.u32 %v1874_v37, %v1873_v59 }
 0x1a1   : > { %v316_v19 = vsel %vm304_vm2, %v4075_v12, %v299_v31  ;;  %v317_v52 = vsel %vm304_vm2, %v299_v31, %v301_v3  ;;  %v829_v39 = vrot.slane %v4073_v26, %v3795_v40  ;;  %v1269_v31 = vrot.slane %v4107_v0, %v3768_v18 }
 0x1a2   : > { %1117 = vst [vmem:[#allocation2 + $0xf8] sm:$0xf0] %v1085_v61  ;;  %1115 = vst [vmem:[#allocation2 + $0xe8] sm:$0xf0] %v1083_v62  ;;  %v438_v11 = vmul.f32 %v397_v24, %v316_v19  ;;  %v439_v45 = vmul.f32 %v401_v23, %v317_v52  ;;  %v1913_v47 = vrot.slane %v4226_v38, %v3602_v42 }
 0x1a3   : > { %1116 = vst [vmem:[#allocation2 + $0xf0] sm:$0xf0] %v1084_v56  ;;  %v722_v12 = vpop.permute.xlu1 %721  ;;  %v1917_v26 = vrot.slane %v4226_v38, %v3572_v27  ;;  %v1921_v42 = vrot.slane %v4226_v38, %v3583_v30  ;;  %v1925_v23 = vrot.slane %v4226_v38, %v3567_v21  ;;  %v1273_v30 = vrot.slane %v4107_v0, %v3786_v33 }
 0x1a4   : > { %454 = vst [vmem:[#allocation2 + $0x60] sm:$0xf] %v438_v11  ;;  %455 = vst [vmem:[#allocation2 + $0x68] sm:$0xf] %v439_v45  ;;  %v303_v9 = vpop.permute.xlu0 %302  ;;  %v739_v14 = vsel %vm727_vm3, %v4091_v29, %v722_v12  ;;  %v1693_v11 = vrot.slane %v4121_v1, %v3768_v18  ;;  %v1277_v59 = vrot.slane %v4107_v0, %v3795_v40 }
 0x1a5   : > { %v318_v63 = vsel %vm304_vm2, %v301_v3, %v303_v9  ;;  %v319_v13 = vsel %vm304_vm2, %v303_v9, %v3690_v16  ;;  %v862_v35 = vmul.f32 %v821_v44, %v739_v14  ;;  %v1281_v37 = vrot.slane %v4107_v0, %v3812_v57 }
 0x1a6   : > { %v440_v24 = vmul.f32 %v405_v17, %v318_v63  ;;  %v441_v4 = vmul.f32 %v409_v25, %v319_v13  ;;  %v1697_v14 = vrot.slane %v4121_v1, %v3786_v33  ;;  %v1701_v0 = vrot.slane %v4121_v1, %v3795_v40 }
 0x1a7   : > { %878 = vst [vmem:[#allocation2 + $0xe0] sm:$0xf] %v862_v35  ;;  %v726_v46 = vpop.permute.xlu1 %725 }
 0x1a8   : > { %456 = vst [vmem:[#allocation2 + $0x70] sm:$0xf] %v440_v24  ;;  %457 = vst [vmem:[#allocation2 + $0x78] sm:$0xf] %v441_v4  ;;  %v724_v32 = vpop.permute.xlu0 %723  ;;  %v742_v29 = vsel %vm727_vm3, %v726_v46, %v3688_v6 }
 0x1a9   : > { %v740_v22 = vsel %vm727_vm3, %v722_v12, %v724_v32  ;;  %v741_v16 = vsel %vm727_vm3, %v724_v32, %v726_v46  ;;  %v865_v5 = vmul.f32 %v833_v15, %v742_v29 }
 0x1aa   : > { %v863_v2 = vmul.f32 %v825_v36, %v740_v22  ;;  %v864_v28 = vmul.f32 %v829_v39, %v741_v16 }
 0x1ab   : > { %881 = vst [vmem:[#allocation2 + $0xf8] sm:$0xf] %v865_v5  ;;  %v1823_v50 = vpop.permute.xlu1 %1822  ;;  %v2004_v36 = vld [vmem:[#allocation2 + $0x68] sm:$0xff]  ;;  %v2003_v39 = vld [vmem:[#allocation2 + $0x60] sm:$0xff] }
 0x1ac   : > { %879 = vst [vmem:[#allocation2 + $0xe8] sm:$0xf] %v863_v2  ;;  %880 = vst [vmem:[#allocation2 + $0xf0] sm:$0xf] %v864_v28  ;;  %v1821_v51 = vpop.permute.xlu0 %1820 }
 0x1ad   : > { %v1843_v6 = vsel %vm1834_vm7, %v4109_v49, %v1821_v51  ;;  %v1844_v7 = vsel %vm1834_vm7, %v1821_v51, %v1823_v50 }
 0x1ae   : > { %v1966_v8 = vmul.f32 %v1913_v47, %v1843_v6  ;;  %v1967_v60 = vmul.f32 %v1917_v26, %v1844_v7  ;;  %v2019_v12 = vld [vmem:[#allocation2 + $0xe0] sm:$0xff] }
 0x1af   : > { %v4245_v27 = vpop.permute.xlu1 %1826  ;;  %v2918_v22 = vpack.c.bf16 %v2019_v12, %v2003_v39  ;;  %v2006_v26 = vld [vmem:[#allocation2 + $0x78] sm:$0xff] }
 0x1b0   : > { %1982 = vst [vmem:[#allocation2 + $0x240] sm:$0xf] %v1966_v8  ;;  %1983 = vst [vmem:[#allocation2 + $0x248] sm:$0xf] %v1967_v60  ;;  %v1825_v61 = vpop.permute.xlu0 %1824 }
 0x1b1   : > { %v1845_v62 = vsel %vm1834_vm7, %v1823_v50, %v1825_v61  ;;  %v1846_v49 = vsel %vm1834_vm7, %v1825_v61, %v4245_v27  ;;  %v1509_v50 = vrot.slane %v4152_v48, %v3786_v33 }
 0x1b2   : > { %v1968_v56 = vmul.f32 %v1921_v42, %v1845_v62  ;;  %v1969_v3 = vmul.f32 %v1925_v23, %v1846_v49  ;;  %v2022_v16 = vld [vmem:[#allocation2 + $0xf8] sm:$0xff]  ;;  %v2005_v42 = vld [vmem:[#allocation2 + $0x70] sm:$0xff] }
 0x1b3   : > { %v1171_v21 = vpop.permute.xlu1 %1170  ;;  %v2020_v45 = vld [vmem:[#allocation2 + $0xe8] sm:$0xff]  ;;  %v2924_v60 = vpack.c.bf16 %v2022_v16, %v2006_v26 }
 0x1b4   : > { %1984 = vst [vmem:[#allocation2 + $0x250] sm:$0xf] %v1968_v56  ;;  %1985 = vst [vmem:[#allocation2 + $0x258] sm:$0xf] %v1969_v3  ;;  %v1169_v19 = vpop.permute.xlu0 %1168  ;;  %v2916_v4 = vpack.c.bf16 %v2020_v45, %v2004_v36 }
 0x1b5   : > { %v1187_v52 = vsel %vm1174_vm4, %v4127_v10, %v1169_v19  ;;  %v1188_v44 = vsel %vm1174_vm4, %v1169_v19, %v1171_v21  ;;  %v1705_v10 = vrot.slane %v4121_v1, %v3812_v57  ;;  %v2021_v1 = vld [vmem:[#allocation2 + $0xf0] sm:$0xff] }
 0x1b6   : > { %v1310_v17 = vmul.f32 %v1269_v31, %v1187_v52  ;;  %v1311_v25 = vmul.f32 %v1273_v30, %v1188_v44  ;;  %v2926_v49 = vpack.c.bf16 %v2021_v1, %v2005_v42  ;;  %v4292_v30 = vld [vmem:[%s4403_s1] sm:$0xff] }
 0x1b7   : > { %v2064_v9 = vld [vmem:[#allocation2 + $0x248] sm:$0xf]  ;;  %v2063_v15 = vld [vmem:[#allocation2 + $0x240] sm:$0xf]  ;;  %v1593_v35 = vpop.permute.xlu1 %1592 }
 0x1b8   : > { %v1342_v63 = vrot.slane %v1310_v17, 4  ;;  %v1343_v13 = vrot.slane %v1311_v25, 4  ;;  %v1173_v24 = vpop.permute.xlu0 %1172  ;;  %2849 = vmatprep.subr.msk.mxu0 %vm2081_vm8, %v2064_v9  ;;  %v1611_v46 = vsel %vm1598_vm5, %v4155_v58, %v1593_v35  ;;  %v1929_v17 = vrot.slane %v4226_v38, %v3768_v18 }
 0x1b9   : > { %v1189_v32 = vsel %vm1174_vm4, %v1171_v21, %v1173_v24  ;;  %v1207_v29 = vsel %vm1174_vm4, %v1173_v24, %v3753_v54  ;;  %2850 = vmatpush1.msk.msra.mxu0 %vm2081_vm8, %v2063_v15  ;;  %v1734_v47 = vmul.f32 %v1693_v11, %v1611_v46  ;;  %v1505_v54 = vrot.slane %v4152_v48, %v3768_v18 }
 0x1ba   : > { %1374 = vst [vmem:[#allocation2 + $0x160] sm:$0xf0] %v1342_v63  ;;  %1375 = vst [vmem:[#allocation2 + $0x168] sm:$0xf0] %v1343_v13  ;;  %v1312_v5 = vmul.f32 %v1277_v59, %v1189_v32  ;;  %v1313_v2 = vmul.f32 %v1281_v37, %v1207_v29  ;;  %2917 = vmatprep.subr.bf16.mxu0 %v2916_v4  ;;  %2851 = vmatmul.mubr.msk.f32.vlgmr.msra.gmra.mrb[4].mxu0 %vm2077_vm9, %v3962_v41 }
 0x1bb   : > { %2919 = vmatpush1.bf16.msra.mxu0 %v2918_v22  ;;  %v2066_v58 = vld [vmem:[#allocation2 + $0x258] sm:$0xf]  ;;  %v2065_v28 = vld [vmem:[#allocation2 + $0x250] sm:$0xf]  ;;  %2620 = vmatprep.mubr.f32.mxu0 %v3181_v20  ;;  %v1766_v51 = vrot.slane %v1734_v47, 4  ;;  %v1597_v8 = vpop.permute.xlu1 %1596  ;;  %v1517_v37 = vrot.slane %v4152_v48, %v3812_v57  ;;  %v1941_v9 = vrot.slane %v4226_v38, %v3812_v57  ;;  %v1937_v13 = vrot.slane %v4226_v38, %v3795_v40 }
 0x1bc   : > { %v1344_v6 = vrot.slane %v1312_v5, 4  ;;  %v1345_v7 = vrot.slane %v1313_v2, 4  ;;  %2852 = vmatprep.subr.msk.mxu1 %vm2081_vm8, %v2066_v58  ;;  %v1595_v41 = vpop.permute.xlu0 %1594  ;;  %v1631_v23 = vsel %vm1598_vm5, %v1597_v8, %v3751_v53 }
 0x1bd   : > { %v1612_v61 = vsel %vm1598_vm5, %v1593_v35, %v1595_v41  ;;  %v1613_v62 = vsel %vm1598_vm5, %v1595_v41, %v1597_v8  ;;  %2853 = vmatpush1.msk.msra.mxu1 %vm2081_vm8, %v2065_v28  ;;  %1798 = vst [vmem:[#allocation2 + $0x1e0] sm:$0xf0] %v1766_v51  ;;  %v1737_v56 = vmul.f32 %v1705_v10, %v1631_v23 }
 0x1be   : > { %1376 = vst [vmem:[#allocation2 + $0x170] sm:$0xf0] %v1344_v6  ;;  %1377 = vst [vmem:[#allocation2 + $0x178] sm:$0xf0] %v1345_v7  ;;  %v1735_v3 = vmul.f32 %v1697_v14, %v1612_v61  ;;  %v1736_v31 = vmul.f32 %v1701_v0, %v1613_v62  ;;  %2925 = vmatprep.subr.bf16.mxu1 %v2924_v60  ;;  %2854 = vmatmul.mubr.msk.f32.vlgmr.msra.gmra.mrb[4].mxu1 %vm2077_vm9, %v4292_v30 }
 0x1bf   : > { %2927 = vmatpush1.bf16.msra.mxu1 %v2926_v49  ;;  %2691 = vmatprep.mubr.f32.mxu1 %v3181_v20  ;;  %v1769_v53 = vrot.slane %v1737_v56, 4  ;;  %v1407_v52 = vpop.permute.xlu1 %1406  ;;  %v1513_v20 = vrot.slane %v4152_v48, %v3795_v40  ;;  %v1933_v10 = vrot.slane %v4226_v38, %v3786_v33 }
 0x1c0   : > { %v1767_v21 = vrot.slane %v1735_v3, 4  ;;  %v1768_v19 = vrot.slane %v1736_v31, 4  ;;  %v1405_v44 = vpop.permute.xlu0 %1404 }
 0x1c1   : > { %v1423_v11 = vsel %vm1410_vm6, %v4171_v34, %v1405_v44  ;;  %v1424_v45 = vsel %vm1410_vm6, %v1405_v44, %v1407_v52  ;;  %1801 = vst [vmem:[#allocation2 + $0x1f8] sm:$0xf0] %v1769_v53  ;;  %v2036_v0 = vld [vmem:[#allocation2 + $0x168] sm:$0xff]  ;;  %v2035_v32 = vld [vmem:[#allocation2 + $0x160] sm:$0xff] }
 0x1c2   : > { %1799 = vst [vmem:[#allocation2 + $0x1e8] sm:$0xf0] %v1767_v21  ;;  %1800 = vst [vmem:[#allocation2 + $0x1f0] sm:$0xf0] %v1768_v19  ;;  %v1546_v25 = vmul.f32 %v1505_v54, %v1423_v11  ;;  %v1547_v59 = vmul.f32 %v1509_v50, %v1424_v45 }
 0x1c3   : > { %v1829_v12 = vpop.permute.xlu1 %1828 }
 0x1c4   : > { %1562 = vst [vmem:[#allocation2 + $0x1e0] sm:$0xf] %v1546_v25  ;;  %1563 = vst [vmem:[#allocation2 + $0x1e8] sm:$0xf] %v1547_v59  ;;  %v1409_v34 = vpop.permute.xlu0 %1408  ;;  %v1847_v18 = vsel %vm1834_vm7, %v4245_v27, %v1829_v12 }
 0x1c5   : > { %v1425_v15 = vsel %vm1410_vm6, %v1407_v52, %v1409_v34  ;;  %v1443_v36 = vsel %vm1410_vm6, %v1409_v34, %v3797_v43  ;;  %v1970_v14 = vmul.f32 %v1929_v17, %v1847_v18  ;;  %v2038_v22 = vld [vmem:[#allocation2 + $0x178] sm:$0xff]  ;;  %v2037_v16 = vld [vmem:[#allocation2 + $0x170] sm:$0xff] }
 0x1c6   : > { %v1548_v48 = vmul.f32 %v1513_v20, %v1425_v15  ;;  %v1549_v63 = vmul.f32 %v1517_v37, %v1443_v36 }
 0x1c7   : > { %1986 = vst [vmem:[#allocation2 + $0x260] sm:$0xf] %v1970_v14  ;;  %v1833_v57 = vpop.permute.xlu1 %1832 }
 0x1c8   : > { %1564 = vst [vmem:[#allocation2 + $0x1f0] sm:$0xf] %v1548_v48  ;;  %1565 = vst [vmem:[#allocation2 + $0x1f8] sm:$0xf] %v1549_v63  ;;  %v1831_v35 = vpop.permute.xlu0 %1830  ;;  %v1867_v27 = vsel %vm1834_vm7, %v1833_v57, %v3918_v55 }
 0x1c9   : > { %v1848_v24 = vsel %vm1834_vm7, %v1829_v12, %v1831_v35  ;;  %v1849_v43 = vsel %vm1834_vm7, %v1831_v35, %v1833_v57  ;;  %v1973_v4 = vmul.f32 %v1941_v9, %v1867_v27 }
 0x1ca   : > { %v1971_v33 = vmul.f32 %v1933_v10, %v1848_v24  ;;  %v1972_v39 = vmul.f32 %v1937_v13, %v1849_v43 }
 0x1cb   : > { %v2052_v46 = vld [vmem:[#allocation2 + $0x1e8] sm:$0xff]  ;;  %v2051_v29 = vld [vmem:[#allocation2 + $0x1e0] sm:$0xff]  ;;  %1989 = vst [vmem:[#allocation2 + $0x278] sm:$0xf] %v1973_v4 }
 0x1cc   : > { %1987 = vst [vmem:[#allocation2 + $0x268] sm:$0xf] %v1971_v33  ;;  %1988 = vst [vmem:[#allocation2 + $0x270] sm:$0xf] %v1972_v39  ;;  %v2920_v40 = vpack.c.bf16 %v2052_v46, %v2036_v0  ;;  %v2922_v38 = vpack.c.bf16 %v2051_v29, %v2035_v32 }
 0x1ce   : > { %2921 = vmatprep.subr.bf16.mxu0 %v2920_v40  ;;  %v2067_v28 = vld [vmem:[#allocation2 + $0x260] sm:$0xf] }
 0x1cf   : > { %2923 = vmatpush1.bf16.msra.mxu0 %v2922_v38  ;;  %v2054_v55 = vld [vmem:[#allocation2 + $0x1f8] sm:$0xff]  ;;  %v2053_v47 = vld [vmem:[#allocation2 + $0x1f0] sm:$0xff] }
 0x1d0   : > { %v2928_v5 = vpack.c.bf16 %v2054_v55, %v2038_v22  ;;  %v2930_v2 = vpack.c.bf16 %v2053_v47, %v2037_v16 }
 0x1d2   : > { %2929 = vmatprep.subr.bf16.mxu1 %v2928_v5  ;;  %v2070_v58 = vld [vmem:[#allocation2 + $0x278] sm:$0xf] }
 0x1d3   : > { %2931 = vmatpush1.bf16.msra.mxu1 %v2930_v2  ;;  %v2068_v1 = vld [vmem:[#allocation2 + $0x268] sm:$0xf]  ;;  %v2069_v26 = vld [vmem:[#allocation2 + $0x270] sm:$0xf] }
 0x1d4   : > { %2855 = vmatprep.subr.msk.mxu0 %vm2081_vm8, %v2068_v1  ;;  %2858 = vmatprep.subr.msk.mxu1 %vm2081_vm8, %v2070_v58 }
 0x1d5   : > { %2856 = vmatpush1.msk.msra.mxu0 %vm2081_vm8, %v2067_v28 }
 0x1d6   : > { %2857 = vmatmul.mubr.msk.f32.vlgmr.msra.gmra.mrb[6].mxu0 %vm2077_vm9, %v4292_v30 }
 0x1d7   : > { %2859 = vmatpush1.msk.msra.mxu1 %vm2081_vm8, %v2069_v26 }
 0x1d8   : > { %2860 = vmatmul.mubr.msk.f32.vlgmr.msra.gmra.mrb[6].mxu1 %vm2077_vm9, %v4292_v30 }
 0x1d9   : > { %v2075_v54 = vpop.permute.xlu0 %2074 }
 0x218   : > { %v2196_v50 = vpop.f32.mrb[0].mxu0 }
 0x219   : > { %v2197_v6 = vadd.f32 %v2196_v50, %v2075_v54  ;;  %v2198_v7 = vpop.f32.mrb[1].mxu0 }
 0x21a   : > { %v2267_v51 = vpop.f32.mrb[0].mxu1  ;;  %v2199_v60 = vadd.f32 %v2198_v7, %v2075_v54 }
 0x21b   : > { %v2269_v8 = vpop.f32.mrb[1].mxu1  ;;  %v2268_v41 = vadd.f32 %v2267_v51, %v2075_v54  ;;  %2698 = vst [vmem:[%s4330_s25] sm:$0xff] %v2197_v6 }
 0x21c   : > { %v2270_v42 = vadd.f32 %v2269_v8, %v2075_v54  ;;  %2699 = vst [vmem:[%s4330_s25 + $0x8] sm:$0xff] %v2199_v60 }
 0x21d   : > { %2700 = vst [vmem:[%s4330_s25 + $0x10] sm:$0xff] %v2268_v41 }
 0x21e   : > { %2701 = vst [vmem:[%s4330_s25 + $0x18] sm:$0xff] %v2270_v42 }
 0x255   : > { %v2338_v23 = vpop.f32.mrb[2].mxu0 }
 0x256   : > { %v2339_v61 = vadd.f32 %v2338_v23, %v2075_v54  ;;  %v2340_v62 = vpop.f32.mrb[3].mxu0 }
 0x257   : > { %v2341_v49 = vadd.f32 %v2340_v62, %v2075_v54 }
 0x258   : > { %2702 = vst [vmem:[%s4330_s25 + $0x20] sm:$0xff] %v2339_v61 }
 0x259   : > { %v2409_v56 = vpop.f32.mrb[2].mxu1  ;;  %2703 = vst [vmem:[%s4330_s25 + $0x28] sm:$0xff] %v2341_v49 }
 0x25a   : > { %v2410_v3 = vadd.f32 %v2409_v56, %v2075_v54  ;;  %v2411_v31 = vpop.f32.mrb[3].mxu1 }
 0x25b   : > { %v2412_v30 = vadd.f32 %v2411_v31, %v2075_v54 }
 0x25c   : > { %2704 = vst [vmem:[%s4330_s25 + $0x30] sm:$0xff] %v2410_v3 }
 0x25d   : > { %2705 = vst [vmem:[%s4330_s25 + $0x38] sm:$0xff] %v2412_v30 }
 0x28d   : > { %v2480_v53 = vpop.f32.mrb[4].mxu0 }
 0x28e   : > { %v2481_v21 = vadd.f32 %v2480_v53, %v2075_v54  ;;  %v2482_v19 = vpop.f32.mrb[5].mxu0 }
 0x28f   : > { %v2483_v52 = vadd.f32 %v2482_v19, %v2075_v54 }
 0x290   : > { %2706 = vst [vmem:[%s4330_s25 + $0x40] sm:$0xff] %v2481_v21 }
 0x291   : > { %v2551_v44 = vpop.f32.mrb[4].mxu1  ;;  %2707 = vst [vmem:[%s4330_s25 + $0x48] sm:$0xff] %v2483_v52 }
 0x292   : > { %v2552_v11 = vadd.f32 %v2551_v44, %v2075_v54  ;;  %v2553_v45 = vpop.f32.mrb[5].mxu1 }
 0x293   : > { %v2554_v17 = vadd.f32 %v2553_v45, %v2075_v54 }
 0x294   : > { %2708 = vst [vmem:[%s4330_s25 + $0x50] sm:$0xff] %v2552_v11 }
 0x295   : > { %2709 = vst [vmem:[%s4330_s25 + $0x58] sm:$0xff] %v2554_v17 }
 0x2a9   : > { %v2622_v25 = vpop.f32.mrb[6].mxu0 }
 0x2aa   : > { %v2623_v59 = vadd.f32 %v2622_v25, %v2075_v54  ;;  %v2624_v20 = vpop.f32.mrb[7].mxu0 }
 0x2ab   : > { %v2625_v37 = vadd.f32 %v2624_v20, %v2075_v54  ;;  %v2693_v12 = vpop.f32.mrb[6].mxu1 }
 0x2ac   : > { %2710 = vst [vmem:[%s4330_s25 + $0x60] sm:$0xff] %v2623_v59  ;;  %v2694_v34 = vadd.f32 %v2693_v12, %v2075_v54  ;;  %v2695_v9 = vpop.f32.mrb[7].mxu1 }
 0x2ad   : > { %2711 = vst [vmem:[%s4330_s25 + $0x68] sm:$0xff] %v2625_v37  ;;  %v2696_v18 = vadd.f32 %v2695_v9, %v2075_v54 }
 0x2ae   : > { %2712 = vst [vmem:[%s4330_s25 + $0x70] sm:$0xff] %v2694_v34 }
 0x2af   : > { %2713 = vst [vmem:[%s4330_s25 + $0x78] sm:$0xff] %v2696_v18 }
 0x2b0   : > { %3096 = shalt.err (!%p3093_p5)
}
 0x2b1   : > { %s3097_s22 = scalar_lea.hbm %s4351_s21, 2048  ;;  %s3101_s30 = scalar_lea.hbm %s4406_s4, 4096 }
 0x2b2   : > { %p3098_p10 = scmp.ne.s32.totalorder %s4351_s21, %s3097_s22  ;;  %p3102_p7 = scmp.lt.u32.totalorder %s4351_s21, %s4406_s4 }
 0x2b3   : > { %p3103_p3 = scmp.lt.u32.totalorder %s3101_s30, %s3097_s22  ;;  %p3105_p2 = scmp.lt.u32.totalorder %s3097_s22, %s4351_s21 }
 0x2b4   : > { %p3099_p4 = pnand %p3098_p10, %p3310_p13 }
 0x2b5   : > { %p3104_p11 = por %p3103_p3, %p3102_p7 }
 0x2b6   : > { %p3100_p1 = pneg %p3099_p4 }
 0x2b7   : > { %p3106_p6 = por %p3105_p2, %p3104_p11 }
 0x2b9   : > { %p3107_p8 = pnand %p3106_p6, %p3100_p1 }
 0x2bb   : > { %3110 = shalt.err (!%p3107_p8)
}
 0x2bc   : > { %2938 = dma.vmem_to_hbm [thread:$0]  (%p3310_p13), %s4353_s27, 2048, %s4351_s21, %s2715_s18  }
 0x2bd PF: > { %s2743_s25 = sand.u32 1, %s3149_s15   ;;  %p4425_p9 = scmp.ne.s32.totalorder %s4414_s26, 0 }
 0x2be   : > { %p4426_p12 = scmp.ge.s32.totalorder %s3169_s20, 2  ;;  %s2744_s23 = scalar_lea.sflag [#allocation5], %s2743_s25 }
 0x2c0   : > { %p2949_p0 = pnand %p4426_p12, %p4425_p9 }
 0x2c2   : > { %3144 = dma.done.wait (!%p2949_p0), %s2744_s23, 2048  }
 0x2c3   : > { %3146 = vsyncadd (!%p2949_p0), %s2744_s23, 4294965248  ;;  %s21_s20 = sadd.s32 1, %s3169_s20   ;;  %s4427_s15 = smov %s3153_s16 }
 0x2c4   : > { %p18_p5 = scmp.ge.s32.totalorder %s21_s20, 4   ;;  %s4428_s16 = smov %s3157_s17 }
 0x2c5   : > { %s4429_s17 = smov %s3318_s10  ;;  %s4430_s18 = smov %s3165_s19 }
 0x2c6   : > { %s4431_s19 = smov %s4433_s5  ;;  %20 = sbr.rel (!%p18_p5) target bundleno = 7 (0x7), region = 100 }
 0x2cd   :  { %2749 = vsyncpa [#allocation4], 1 }
 0x2ce   :  { %2751 = vsyncpa [#allocation4 + $0x1], 1 }
 0x2cf   :  { %2752 = vsyncpa [#allocation7], 1 }
 0x2d0   :  { %2753 = vsyncpa [#allocation5], 1 }
 0x2d1   :  { %2755 = vsyncpa [#allocation5 + $0x1], 1 }

</bundles_post_ra>
